<compile_context>
chip_gen: v7x
topology: tpu7x:2x2x1
jax: 0.10.0
libtpu: 0.0.40
codegen_flags: <defaults>
</compile_context>

<pallas_src>
import numpy as np
import jax
import jax.numpy as jnp
from jax import lax
from jax.experimental import pallas as pl
from jax.experimental.pallas import tpu as pltpu


def _round_up(x, m):
    return ((x + m - 1) // m) * m


# ----------------------------------------------------------------------------
# Pallas kernel: one tile of TILE_P points (on lanes), full mesh tables in VMEM.
# ----------------------------------------------------------------------------
def _make_surface_field_kernel(K: int):
    """K = number of candidate faces per vertex (static)."""

    def kernel(pts_ref, verts_ref, vtab_ref, ftab_ref, out_ref):
        TP = pts_ref.shape[1]
        Vp = verts_ref.shape[0]
        Fp = ftab_ref.shape[1]

        px = pts_ref[0:1, :]                  # (1, TP)
        py = pts_ref[1:2, :]
        pz = pts_ref[2:3, :]

        # ---- nearest vertex on the deformed mesh (V on sublanes, pts on lanes)
        vx = verts_ref[:, 0:1]                # (Vp, 1)
        vy = verts_ref[:, 1:2]
        vz = verts_ref[:, 2:3]
        dx = vx - px                          # (Vp, TP)
        dy = vy - py
        dz = vz - pz
        d2 = dx * dx + dy * dy + dz * dz

        iota_v = lax.broadcasted_iota(jnp.int32, (Vp, TP), 0).astype(jnp.float32)
        dmin = jnp.min(d2, axis=0, keepdims=True)                     # (1, TP)
        idx_cand = jnp.where(d2 == dmin, iota_v, jnp.float32(Vp))
        nearest_idx = jnp.min(idx_cand, axis=0, keepdims=True)        # (1, TP)
        onehot_v = (iota_v == nearest_idx).astype(jnp.float32)        # (Vp, TP)

        # ---- gather ALL per-vertex attributes with one MXU matmul -----------
        # rows [0,K): candidate face ids, [K,4K): candidate face normals,
        # rows [4K,4K+3): vertex coordinates.
        vg = jnp.dot(vtab_ref[...], onehot_v,
                     precision=lax.Precision.HIGHEST,
                     preferred_element_type=jnp.float32)              # (CV, TP)

        nvx = vg[4 * K + 0:4 * K + 1, :]
        nvy = vg[4 * K + 1:4 * K + 2, :]
        nvz = vg[4 * K + 2:4 * K + 3, :]

        lvx, lvy, lvz = px - nvx, py - nvy, pz - nvz
        look_dist = jnp.sqrt(lvx * lvx + lvy * lvy + lvz * lvz)
        denom = jnp.maximum(look_dist, 1e-8)
        ldx, ldy, ldz = lvx / denom, lvy / denom, lvz / denom

        # ---- pick among K candidate faces (pure (1,TP) work, no F-wide ops) --
        best_angle = None
        best_face = None
        for k in range(K):
            fid_k = jnp.floor(vg[k:k + 1, :] + 0.5)   # exact integer face id
            nkx = vg[K + 3 * k + 0:K + 3 * k + 1, :]
            nky = vg[K + 3 * k + 1:K + 3 * k + 2, :]
            nkz = vg[K + 3 * k + 2:K + 3 * k + 3, :]
            cosk = ldx * nkx + ldy * nky + ldz * nkz
            ang = 1.0 - jnp.abs(cosk)
            if k == 0:
                best_angle, best_face = ang, fid_k
            else:
                upd = ang < best_angle        # strict < keeps first min (torch argmin)
                best_angle = jnp.where(upd, ang, best_angle)
                best_face = jnp.where(upd, fid_k, best_face)

        # ---- gather the selected face's attributes with one MXU matmul ------
        iota_f = lax.broadcasted_iota(jnp.int32, (Fp, TP), 0).astype(jnp.float32)
        oh_face = (iota_f == best_face).astype(jnp.float32)           # (Fp, TP)
        fg = jnp.dot(ftab_ref[...], oh_face,
                     precision=lax.Precision.HIGHEST,
                     preferred_element_type=jnp.float32)              # (24, TP)

        def row(r):
            return fg[r:r + 1, :]

        # ---- project onto the selected face (deformed mesh) ------------------
        nix, niy, niz = row(0), row(1), row(2)
        proj_dist = nix * lvx + niy * lvy + niz * lvz
        ppx = px - nix * proj_dist
        ppy = py - niy * proj_dist
        ppz = pz - niz * proj_dist

        tvi = [(row(3 + 3 * j), row(4 + 3 * j), row(5 + 3 * j)) for j in range(3)]

        # ---- barycentric weights (same formulation as the torch code) --------
        d_list, u_list = [], []
        for j in range(3):
            djx = tvi[j][0] - ppx
            djy = tvi[j][1] - ppy
            djz = tvi[j][2] - ppz
            dj = jnp.maximum(jnp.sqrt(djx * djx + djy * djy + djz * djz), 1e-8)
            d_list.append(dj)
            u_list.append((djx / dj, djy / dj, djz / dj))

        i_left = (2, 0, 1)
        i_right = (1, 2, 0)
        w = []
        for j in range(3):
            a = u_list[i_right[j]]
            b = u_list[i_left[j]]
            cx = a[1] * b[2] - a[2] * b[1]
            cy = a[2] * b[0] - a[0] * b[2]
            cz = a[0] * b[1] - a[1] * b[0]
            dot_p = cx * ppx + cy * ppy + cz * ppz
            sgn = jnp.where(dot_p > 0.0, 1.0, jnp.where(dot_p < 0.0, -1.0, 0.0))
            sin_t = jnp.sqrt(cx * cx + cy * cy + cz * cz)
            w.append(sin_t * d_list[i_left[j]] * d_list[i_right[j]] * sgn)
        wsum = w[0] + w[1] + w[2]
        w = [wi / wsum for wi in w]

        # ---- deferred projection onto the rest-pose mesh ----------------------
        n0x, n0y, n0z = row(12), row(13), row(14)
        tv0 = [(row(15 + 3 * j), row(16 + 3 * j), row(17 + 3 * j)) for j in range(3)]

        ox = w[0] * tv0[0][0] + w[1] * tv0[1][0] + w[2] * tv0[2][0] + n0x * proj_dist
        oy = w[0] * tv0[0][1] + w[1] * tv0[1][1] + w[2] * tv0[2][1] + n0y * proj_dist
        oz = w[0] * tv0[0][2] + w[1] * tv0[1][2] + w[2] * tv0[2][2] + n0z * proj_dist

        out_ref[...] = jnp.concatenate([ox, oy, oz], axis=0)          # (3, TP)

    return kernel


# ----------------------------------------------------------------------------
# Wrapper: fixed-topology precompute (face normals, stacked gather tables),
# padding, transposes and the pallas_call.
# ----------------------------------------------------------------------------
def _face_geometry(verts, faces):
    fv = verts[faces]                                                 # (F, 3, 3)
    n = jnp.cross(fv[:, 1] - fv[:, 0], fv[:, 2] - fv[:, 0])
    n = n / jnp.linalg.norm(n, axis=-1, keepdims=True)
    return fv, n


def surface_field_project(pts, verts_i, verts_0, faces, v_faces, *, tile_p=128):
    pts = pts.astype(jnp.float32)
    verts_i = verts_i.astype(jnp.float32)
    verts_0 = verts_0.astype(jnp.float32)

    P = pts.shape[0]
    V = verts_i.shape[0]
    F = faces.shape[0]
    K = v_faces.shape[1]
    assert tile_p % 128 == 0, "tile_p must be a multiple of 128 (lane width)"
    # face/vertex ids are carried as float32; keep them exactly representable
    assert V < (1 << 23) and F < (1 << 23)

    # ---- per-face geometry, hoisted out of the kernel (computed once) --------
    fv_i, fn_i = _face_geometry(verts_i, faces)
    fv_0, fn_0 = _face_geometry(verts_0, faces)

    # ---- stacked per-vertex gather table (4K+3, V) ---------------------------
    cand_n = fn_i[v_faces]                                            # (V, K, 3)
    vtab = jnp.concatenate([
        v_faces.astype(jnp.float32),                                  # [0, K)
        cand_n.reshape(V, 3 * K),                                     # [K, 4K)
        verts_i,                                                      # [4K, 4K+3)
    ], axis=1).T                                                      # (4K+3, V)

    # ---- stacked per-face gather table (24, F) -------------------------------
    ftab = jnp.concatenate([
        fn_i,                                                         # [0, 3)
        fv_i.reshape(F, 9),                                           # [3, 12)
        fn_0,                                                         # [12, 15)
        fv_0.reshape(F, 9),                                           # [15, 24)
    ], axis=1).T                                                      # (24, F)

    # ---- padding: V/F/P lanes to 128, table rows to a multiple of 8 ----------
    # Pad with duplicates (mode="edge") so argmin / one-hot semantics hold.
    V_pad = _round_up(V, 128)
    F_pad = _round_up(F, 128)
    P_pad = _round_up(P, tile_p)
    CV = _round_up(4 * K + 3, 8)

    vtab = jnp.pad(vtab, ((0, CV - (4 * K + 3)), (0, V_pad - V)), mode="edge")
    ftab = jnp.pad(ftab, ((0, 0), (0, F_pad - F)), mode="edge")
    verts_i_pad = jnp.pad(verts_i, ((0, V_pad - V), (0, 0)), mode="edge")
    pts_t = jnp.pad(pts.T, ((0, 0), (0, P_pad - P)), mode="edge")     # (3, P_pad)

    out = pl.pallas_call(
        _make_surface_field_kernel(K),
        out_shape=jax.ShapeDtypeStruct((3, P_pad), jnp.float32),
        grid_spec=pltpu.PrefetchScalarGridSpec(
            num_scalar_prefetch=0,
            grid=(P_pad // tile_p,),
            in_specs=[
                pl.BlockSpec((3, tile_p), lambda i: (0, i)),          # points (lane-dense)
                pl.BlockSpec((V_pad, 3), lambda i: (0, 0)),           # vertex coords
                pl.BlockSpec((CV, V_pad), lambda i: (0, 0)),          # per-vertex table
                pl.BlockSpec((24, F_pad), lambda i: (0, 0)),          # per-face table
            ],
            out_specs=pl.BlockSpec((3, tile_p), lambda i: (0, i)),
        ),
        compiler_params=pltpu.CompilerParams(
            dimension_semantics=("parallel",),
            vmem_limit_bytes=48 * 1024 * 1024,
        ),
    )(pts_t, verts_i_pad, vtab, ftab)

    return out[:, :P].T                                               # (P, 3)


# ----------------------------------------------------------------------------
# Pure-JAX reference mirroring the torch forward pass (for validation).
# ----------------------------------------------------------------------------
def surface_field_ref(pts, verts_i, verts_0, faces, v_faces):
    P = pts.shape[0]
    diffs = ((pts[:, None, :] - verts_i[None, :, :]) ** 2).sum(-1)
    nearest_vi = jnp.argmin(diffs, axis=-1)
    look_vector = pts - verts_i[nearest_vi]
    look_dist = jnp.linalg.norm(look_vector, axis=-1)
    look_dir = look_vector / jnp.maximum(look_dist[:, None], 1e-8)

    fv_i = verts_i[faces]
    fn_i = jnp.cross(fv_i[:, 1] - fv_i[:, 0], fv_i[:, 2] - fv_i[:, 0])
    fn_i = fn_i / jnp.linalg.norm(fn_i, axis=-1, keepdims=True)

    nvf = v_faces[nearest_vi]                              # (P, K)
    cos = jnp.sum(look_dir[:, None, :] * fn_i[nvf], -1)
    angle_dist = 1.0 - jnp.abs(cos)
    nn = jnp.argmin(angle_dist, axis=-1)
    nearest_face_id = nvf[jnp.arange(P), nn]

    nfn_i = fn_i[nearest_face_id]
    proj_dist = jnp.sum(nfn_i * look_vector, -1)
    proj_pts = pts - nfn_i * proj_dist[:, None]

    tri = verts_i[faces[nearest_face_id]]                  # (P, 3, 3)
    diff = tri - proj_pts[:, None, :]
    d = jnp.maximum(jnp.linalg.norm(diff, axis=-1), 1e-8)
    u = diff / d[..., None]
    i_left = jnp.array([2, 0, 1])
    i_right = jnp.array([1, 2, 0])
    cp = jnp.cross(u[:, i_right, :], u[:, i_left, :])
    sign = jnp.sign(jnp.sum(cp * proj_pts[:, None, :], -1))
    sin_t = jnp.linalg.norm(cp, axis=-1)
    w = sin_t * d[:, i_left] * d[:, i_right] * jnp.sign(sign)
    w = w / w.sum(-1, keepdims=True)

    fv_0 = verts_0[faces]
    fn_0 = jnp.cross(fv_0[:, 1] - fv_0[:, 0], fv_0[:, 2] - fv_0[:, 0])
    fn_0 = fn_0 / jnp.linalg.norm(fn_0, axis=-1, keepdims=True)
    tri0 = verts_0[faces[nearest_face_id]]
    proj0 = (w[..., None] * tri0).sum(-2)
    return proj0 + fn_0[nearest_face_id] * proj_dist[:, None]


# ----------------------------------------------------------------------------
# Demo / self-test.
# ----------------------------------------------------------------------------
if __name__ == "__main__":
    # --- build a small deterministic triangulated grid mesh (rest pose) ------
    n = 5
    V = n * n
    xs, ys = np.meshgrid(np.linspace(0.0, 1.0, n), np.linspace(0.0, 1.0, n),
                         indexing="ij")
    base = np.stack([xs.ravel(), ys.ravel(), np.full(V, 2.0)], -1).astype(np.float32)

    faces_list = []
    for i in range(n - 1):
        for j in range(n - 1):
            a = i * n + j
            b = i * n + j + 1
            c = (i + 1) * n + j
            dd = (i + 1) * n + j + 1
            faces_list.append([a, b, c])
            faces_list.append([b, dd, c])
    faces_np = np.array(faces_list, dtype=np.int32)        # (F, 3)

    # vertex -> adjacent faces table (same construction as the module __init__)
    v_faces_lists = [[] for _ in range(V)]
    for fi, f in enumerate(faces_np):
        for vi in f:
            if fi not in v_faces_lists[int(vi)]:
                v_faces_lists[int(vi)].append(fi)
    max_len = max(len(x) for x in v_faces_lists)
    v_faces_np = np.array([x + [x[-1]] * (max_len - len(x)) for x in v_faces_lists],
                          dtype=np.int32)                   # (V, K)

    # --- deterministic inputs --------------------------------------------------
    key = jax.random.PRNGKey(0)
    k1, k2, k3 = jax.random.split(key, 3)
    verts_0 = jnp.asarray(base) + 0.05 * jax.random.normal(k1, (V, 3), jnp.float32)
    verts_i = verts_0 + 0.08 * jax.random.normal(k2, (V, 3), jnp.float32)

    P = 256
    pts = jax.random.uniform(
        k3, (P, 3), jnp.float32,
        minval=jnp.array([0.0, 0.0, 1.8], jnp.float32),
        maxval=jnp.array([1.0, 1.0, 2.2], jnp.float32))

    faces = jnp.asarray(faces_np)
    v_faces = jnp.asarray(v_faces_np)

    # --- run Pallas kernel (tile_p=128 -> grid of 2, feeds both v7x cores) -----
    out = surface_field_project(pts, verts_i, verts_0, faces, v_faces, tile_p=128)
    out = jax.block_until_ready(out)

    # --- validate against the pure-JAX (torch-faithful) reference ---------------
    ref = surface_field_ref(pts, verts_i, verts_0, faces, v_faces)
    np.testing.assert_allclose(np.asarray(out), np.asarray(ref),
                               rtol=1e-3, atol=1e-3)

    print("KERNEL_OK")
</pallas_src>

<mosaic_0001>
module attributes {stable_mosaic.version = 11 : i64} {
  func.func @kernel(%arg0: i32, %arg1: memref<3x128xf32, #tpu.memory_space<vmem>>, %arg2: memref<128x3xf32, #tpu.memory_space<vmem>>, %arg3: memref<32x128xf32, #tpu.memory_space<vmem>>, %arg4: memref<24x128xf32, #tpu.memory_space<vmem>>, %arg5: memref<3x128xf32, #tpu.memory_space<vmem>>) attributes {dimension_semantics = [#tpu.dimension_semantics<parallel>], iteration_bounds = array<i64: 2>, scalar_prefetch = 0 : i64, scratch_operands = 0 : i64, tpu.core_type = #tpu.core_type<tc>, window_params = [{transform_indices = @transform_0, window_bounds = array<i64: 3, 128>}, {pipeline_mode = #tpu.pipeline_mode<synchronous>, transform_indices = @transform_1, window_bounds = array<i64: 128, 3>}, {pipeline_mode = #tpu.pipeline_mode<synchronous>, transform_indices = @transform_2, window_bounds = array<i64: 32, 128>}, {pipeline_mode = #tpu.pipeline_mode<synchronous>, transform_indices = @transform_3, window_bounds = array<i64: 24, 128>}, {transform_indices = @transform_4, window_bounds = array<i64: 3, 128>}]} {
    %c0 = arith.constant 0 : index
    %c0_0 = arith.constant 0 : index
    %0 = vector.load %arg1[%c0, %c0_0] : memref<3x128xf32, #tpu.memory_space<vmem>>, vector<1x128xf32>
    %c1 = arith.constant 1 : index
    %c0_1 = arith.constant 0 : index
    %1 = vector.load %arg1[%c1, %c0_1] : memref<3x128xf32, #tpu.memory_space<vmem>>, vector<1x128xf32>
    %c2 = arith.constant 2 : index
    %c0_2 = arith.constant 0 : index
    %2 = vector.load %arg1[%c2, %c0_2] : memref<3x128xf32, #tpu.memory_space<vmem>>, vector<1x128xf32>
    %c0_3 = arith.constant 0 : index
    %c0_4 = arith.constant 0 : index
    %3 = vector.load %arg2[%c0_3, %c0_4] : memref<128x3xf32, #tpu.memory_space<vmem>>, vector<128x1xf32>
    %c0_5 = arith.constant 0 : index
    %c1_6 = arith.constant 1 : index
    %4 = vector.load %arg2[%c0_5, %c1_6] : memref<128x3xf32, #tpu.memory_space<vmem>>, vector<128x1xf32>
    %c0_7 = arith.constant 0 : index
    %c2_8 = arith.constant 2 : index
    %5 = vector.load %arg2[%c0_7, %c2_8] : memref<128x3xf32, #tpu.memory_space<vmem>>, vector<128x1xf32>
    %6 = vector.broadcast %3 : vector<128x1xf32> to vector<128x128xf32>
    %7 = vector.broadcast %0 : vector<1x128xf32> to vector<128x128xf32>
    %8 = arith.subf %6, %7 : vector<128x128xf32>
    %9 = vector.broadcast %4 : vector<128x1xf32> to vector<128x128xf32>
    %10 = vector.broadcast %1 : vector<1x128xf32> to vector<128x128xf32>
    %11 = arith.subf %9, %10 : vector<128x128xf32>
    %12 = vector.broadcast %5 : vector<128x1xf32> to vector<128x128xf32>
    %13 = vector.broadcast %2 : vector<1x128xf32> to vector<128x128xf32>
    %14 = arith.subf %12, %13 : vector<128x128xf32>
    %15 = arith.mulf %8, %8 : vector<128x128xf32>
    %16 = arith.mulf %11, %11 : vector<128x128xf32>
    %17 = arith.addf %15, %16 : vector<128x128xf32>
    %18 = arith.mulf %14, %14 : vector<128x128xf32>
    %19 = arith.addf %17, %18 : vector<128x128xf32>
    %20 = tpu.iota {dimensions = array<i32: 0>} : vector<128x128xi32>
    %21 = arith.sitofp %20 : vector<128x128xi32> to vector<128x128xf32>
    %cst = arith.constant dense<0x7F800000> : vector<128xf32>
    %22 = vector.multi_reduction <minimumf>, %19, %cst [0] : vector<128x128xf32> to vector<128xf32>
    %23 = vector.shape_cast %22 : vector<128xf32> to vector<1x128xf32>
    %24 = vector.broadcast %23 : vector<1x128xf32> to vector<128x128xf32>
    %25 = arith.cmpf oeq, %19, %24 : vector<128x128xf32>
    %cst_9 = arith.constant 1.280000e+02 : f32
    %26 = vector.broadcast %cst_9 : f32 to vector<128x128xf32>
    %27 = arith.select %25, %21, %26 : vector<128x128xi1>, vector<128x128xf32>
    %cst_10 = arith.constant dense<0x7F800000> : vector<128xf32>
    %28 = vector.multi_reduction <minimumf>, %27, %cst_10 [0] : vector<128x128xf32> to vector<128xf32>
    %29 = vector.shape_cast %28 : vector<128xf32> to vector<1x128xf32>
    %30 = vector.broadcast %29 : vector<1x128xf32> to vector<128x128xf32>
    %31 = arith.cmpf oeq, %21, %30 : vector<128x128xf32>
    %32 = arith.extui %31 : vector<128x128xi1> to vector<128x128xi32>
    %33 = arith.sitofp %32 : vector<128x128xi32> to vector<128x128xf32>
    %c0_11 = arith.constant 0 : index
    %c0_12 = arith.constant 0 : index
    %34 = vector.load %arg3[%c0_11, %c0_12] : memref<32x128xf32, #tpu.memory_space<vmem>>, vector<32x128xf32>
    %cst_13 = arith.constant dense<0.000000e+00> : vector<32x128xf32>
    %35 = tpu.matmul %34, %33, %cst_13 {dimension_numbers = #tpu.dot_dimension_numbers<[1], [0], [0], [1], [0, 0, 1, 1], [], []>, precision = #tpu.contract_precision<fp32>} : vector<32x128xf32>, vector<128x128xf32>, vector<32x128xf32> -> vector<32x128xf32>
    %36 = vector.extract_strided_slice %35 {offsets = [24, 0], sizes = [1, 128], strides = [1, 1]} : vector<32x128xf32> to vector<1x128xf32>
    %37 = vector.extract_strided_slice %35 {offsets = [25, 0], sizes = [1, 128], strides = [1, 1]} : vector<32x128xf32> to vector<1x128xf32>
    %38 = vector.extract_strided_slice %35 {offsets = [26, 0], sizes = [1, 128], strides = [1, 1]} : vector<32x128xf32> to vector<1x128xf32>
    %39 = arith.subf %0, %36 : vector<1x128xf32>
    %40 = arith.subf %1, %37 : vector<1x128xf32>
    %41 = arith.subf %2, %38 : vector<1x128xf32>
    %42 = arith.mulf %39, %39 : vector<1x128xf32>
    %43 = arith.mulf %40, %40 : vector<1x128xf32>
    %44 = arith.addf %42, %43 : vector<1x128xf32>
    %45 = arith.mulf %41, %41 : vector<1x128xf32>
    %46 = arith.addf %44, %45 : vector<1x128xf32>
    %47 = math.sqrt %46 : vector<1x128xf32>
    %cst_14 = arith.constant 9.99999993E-9 : f32
    %48 = vector.broadcast %cst_14 : f32 to vector<1x128xf32>
    %49 = arith.maximumf %47, %48 : vector<1x128xf32>
    %50 = arith.divf %39, %49 : vector<1x128xf32>
    %51 = arith.divf %40, %49 : vector<1x128xf32>
    %52 = arith.divf %41, %49 : vector<1x128xf32>
    %53 = vector.extract_strided_slice %35 {offsets = [0, 0], sizes = [1, 128], strides = [1, 1]} : vector<32x128xf32> to vector<1x128xf32>
    %cst_15 = arith.constant 5.000000e-01 : f32
    %54 = vector.broadcast %cst_15 : f32 to vector<1x128xf32>
    %55 = arith.addf %53, %54 : vector<1x128xf32>
    %56 = math.floor %55 : vector<1x128xf32>
    %57 = vector.extract_strided_slice %35 {offsets = [6, 0], sizes = [1, 128], strides = [1, 1]} : vector<32x128xf32> to vector<1x128xf32>
    %58 = vector.extract_strided_slice %35 {offsets = [7, 0], sizes = [1, 128], strides = [1, 1]} : vector<32x128xf32> to vector<1x128xf32>
    %59 = vector.extract_strided_slice %35 {offsets = [8, 0], sizes = [1, 128], strides = [1, 1]} : vector<32x128xf32> to vector<1x128xf32>
    %60 = arith.mulf %50, %57 : vector<1x128xf32>
    %61 = arith.mulf %51, %58 : vector<1x128xf32>
    %62 = arith.addf %60, %61 : vector<1x128xf32>
    %63 = arith.mulf %52, %59 : vector<1x128xf32>
    %64 = arith.addf %62, %63 : vector<1x128xf32>
    %65 = math.absf %64 : vector<1x128xf32>
    %cst_16 = arith.constant 1.000000e+00 : f32
    %66 = vector.broadcast %cst_16 : f32 to vector<1x128xf32>
    %67 = arith.subf %66, %65 : vector<1x128xf32>
    %68 = vector.extract_strided_slice %35 {offsets = [1, 0], sizes = [1, 128], strides = [1, 1]} : vector<32x128xf32> to vector<1x128xf32>
    %cst_17 = arith.constant 5.000000e-01 : f32
    %69 = vector.broadcast %cst_17 : f32 to vector<1x128xf32>
    %70 = arith.addf %68, %69 : vector<1x128xf32>
    %71 = math.floor %70 : vector<1x128xf32>
    %72 = vector.extract_strided_slice %35 {offsets = [9, 0], sizes = [1, 128], strides = [1, 1]} : vector<32x128xf32> to vector<1x128xf32>
    %73 = vector.extract_strided_slice %35 {offsets = [10, 0], sizes = [1, 128], strides = [1, 1]} : vector<32x128xf32> to vector<1x128xf32>
    %74 = vector.extract_strided_slice %35 {offsets = [11, 0], sizes = [1, 128], strides = [1, 1]} : vector<32x128xf32> to vector<1x128xf32>
    %75 = arith.mulf %50, %72 : vector<1x128xf32>
    %76 = arith.mulf %51, %73 : vector<1x128xf32>
    %77 = arith.addf %75, %76 : vector<1x128xf32>
    %78 = arith.mulf %52, %74 : vector<1x128xf32>
    %79 = arith.addf %77, %78 : vector<1x128xf32>
    %80 = math.absf %79 : vector<1x128xf32>
    %cst_18 = arith.constant 1.000000e+00 : f32
    %81 = vector.broadcast %cst_18 : f32 to vector<1x128xf32>
    %82 = arith.subf %81, %80 : vector<1x128xf32>
    %83 = arith.cmpf olt, %82, %67 : vector<1x128xf32>
    %84 = arith.select %83, %82, %67 : vector<1x128xi1>, vector<1x128xf32>
    %85 = arith.select %83, %71, %56 : vector<1x128xi1>, vector<1x128xf32>
    %86 = vector.extract_strided_slice %35 {offsets = [2, 0], sizes = [1, 128], strides = [1, 1]} : vector<32x128xf32> to vector<1x128xf32>
    %cst_19 = arith.constant 5.000000e-01 : f32
    %87 = vector.broadcast %cst_19 : f32 to vector<1x128xf32>
    %88 = arith.addf %86, %87 : vector<1x128xf32>
    %89 = math.floor %88 : vector<1x128xf32>
    %90 = vector.extract_strided_slice %35 {offsets = [12, 0], sizes = [1, 128], strides = [1, 1]} : vector<32x128xf32> to vector<1x128xf32>
    %91 = vector.extract_strided_slice %35 {offsets = [13, 0], sizes = [1, 128], strides = [1, 1]} : vector<32x128xf32> to vector<1x128xf32>
    %92 = vector.extract_strided_slice %35 {offsets = [14, 0], sizes = [1, 128], strides = [1, 1]} : vector<32x128xf32> to vector<1x128xf32>
    %93 = arith.mulf %50, %90 : vector<1x128xf32>
    %94 = arith.mulf %51, %91 : vector<1x128xf32>
    %95 = arith.addf %93, %94 : vector<1x128xf32>
    %96 = arith.mulf %52, %92 : vector<1x128xf32>
    %97 = arith.addf %95, %96 : vector<1x128xf32>
    %98 = math.absf %97 : vector<1x128xf32>
    %cst_20 = arith.constant 1.000000e+00 : f32
    %99 = vector.broadcast %cst_20 : f32 to vector<1x128xf32>
    %100 = arith.subf %99, %98 : vector<1x128xf32>
    %101 = arith.cmpf olt, %100, %84 : vector<1x128xf32>
    %102 = arith.select %101, %100, %84 : vector<1x128xi1>, vector<1x128xf32>
    %103 = arith.select %101, %89, %85 : vector<1x128xi1>, vector<1x128xf32>
    %104 = vector.extract_strided_slice %35 {offsets = [3, 0], sizes = [1, 128], strides = [1, 1]} : vector<32x128xf32> to vector<1x128xf32>
    %cst_21 = arith.constant 5.000000e-01 : f32
    %105 = vector.broadcast %cst_21 : f32 to vector<1x128xf32>
    %106 = arith.addf %104, %105 : vector<1x128xf32>
    %107 = math.floor %106 : vector<1x128xf32>
    %108 = vector.extract_strided_slice %35 {offsets = [15, 0], sizes = [1, 128], strides = [1, 1]} : vector<32x128xf32> to vector<1x128xf32>
    %109 = vector.extract_strided_slice %35 {offsets = [16, 0], sizes = [1, 128], strides = [1, 1]} : vector<32x128xf32> to vector<1x128xf32>
    %110 = vector.extract_strided_slice %35 {offsets = [17, 0], sizes = [1, 128], strides = [1, 1]} : vector<32x128xf32> to vector<1x128xf32>
    %111 = arith.mulf %50, %108 : vector<1x128xf32>
    %112 = arith.mulf %51, %109 : vector<1x128xf32>
    %113 = arith.addf %111, %112 : vector<1x128xf32>
    %114 = arith.mulf %52, %110 : vector<1x128xf32>
    %115 = arith.addf %113, %114 : vector<1x128xf32>
    %116 = math.absf %115 : vector<1x128xf32>
    %cst_22 = arith.constant 1.000000e+00 : f32
    %117 = vector.broadcast %cst_22 : f32 to vector<1x128xf32>
    %118 = arith.subf %117, %116 : vector<1x128xf32>
    %119 = arith.cmpf olt, %118, %102 : vector<1x128xf32>
    %120 = arith.select %119, %118, %102 : vector<1x128xi1>, vector<1x128xf32>
    %121 = arith.select %119, %107, %103 : vector<1x128xi1>, vector<1x128xf32>
    %122 = vector.extract_strided_slice %35 {offsets = [4, 0], sizes = [1, 128], strides = [1, 1]} : vector<32x128xf32> to vector<1x128xf32>
    %cst_23 = arith.constant 5.000000e-01 : f32
    %123 = vector.broadcast %cst_23 : f32 to vector<1x128xf32>
    %124 = arith.addf %122, %123 : vector<1x128xf32>
    %125 = math.floor %124 : vector<1x128xf32>
    %126 = vector.extract_strided_slice %35 {offsets = [18, 0], sizes = [1, 128], strides = [1, 1]} : vector<32x128xf32> to vector<1x128xf32>
    %127 = vector.extract_strided_slice %35 {offsets = [19, 0], sizes = [1, 128], strides = [1, 1]} : vector<32x128xf32> to vector<1x128xf32>
    %128 = vector.extract_strided_slice %35 {offsets = [20, 0], sizes = [1, 128], strides = [1, 1]} : vector<32x128xf32> to vector<1x128xf32>
    %129 = arith.mulf %50, %126 : vector<1x128xf32>
    %130 = arith.mulf %51, %127 : vector<1x128xf32>
    %131 = arith.addf %129, %130 : vector<1x128xf32>
    %132 = arith.mulf %52, %128 : vector<1x128xf32>
    %133 = arith.addf %131, %132 : vector<1x128xf32>
    %134 = math.absf %133 : vector<1x128xf32>
    %cst_24 = arith.constant 1.000000e+00 : f32
    %135 = vector.broadcast %cst_24 : f32 to vector<1x128xf32>
    %136 = arith.subf %135, %134 : vector<1x128xf32>
    %137 = arith.cmpf olt, %136, %120 : vector<1x128xf32>
    %138 = arith.select %137, %136, %120 : vector<1x128xi1>, vector<1x128xf32>
    %139 = arith.select %137, %125, %121 : vector<1x128xi1>, vector<1x128xf32>
    %140 = vector.extract_strided_slice %35 {offsets = [5, 0], sizes = [1, 128], strides = [1, 1]} : vector<32x128xf32> to vector<1x128xf32>
    %cst_25 = arith.constant 5.000000e-01 : f32
    %141 = vector.broadcast %cst_25 : f32 to vector<1x128xf32>
    %142 = arith.addf %140, %141 : vector<1x128xf32>
    %143 = math.floor %142 : vector<1x128xf32>
    %144 = vector.extract_strided_slice %35 {offsets = [21, 0], sizes = [1, 128], strides = [1, 1]} : vector<32x128xf32> to vector<1x128xf32>
    %145 = vector.extract_strided_slice %35 {offsets = [22, 0], sizes = [1, 128], strides = [1, 1]} : vector<32x128xf32> to vector<1x128xf32>
    %146 = vector.extract_strided_slice %35 {offsets = [23, 0], sizes = [1, 128], strides = [1, 1]} : vector<32x128xf32> to vector<1x128xf32>
    %147 = arith.mulf %50, %144 : vector<1x128xf32>
    %148 = arith.mulf %51, %145 : vector<1x128xf32>
    %149 = arith.addf %147, %148 : vector<1x128xf32>
    %150 = arith.mulf %52, %146 : vector<1x128xf32>
    %151 = arith.addf %149, %150 : vector<1x128xf32>
    %152 = math.absf %151 : vector<1x128xf32>
    %cst_26 = arith.constant 1.000000e+00 : f32
    %153 = vector.broadcast %cst_26 : f32 to vector<1x128xf32>
    %154 = arith.subf %153, %152 : vector<1x128xf32>
    %155 = arith.cmpf olt, %154, %138 : vector<1x128xf32>
    %156 = arith.select %155, %143, %139 : vector<1x128xi1>, vector<1x128xf32>
    %157 = tpu.iota {dimensions = array<i32: 0>} : vector<128x128xi32>
    %158 = arith.sitofp %157 : vector<128x128xi32> to vector<128x128xf32>
    %159 = vector.broadcast %156 : vector<1x128xf32> to vector<128x128xf32>
    %160 = arith.cmpf oeq, %158, %159 : vector<128x128xf32>
    %161 = arith.extui %160 : vector<128x128xi1> to vector<128x128xi32>
    %162 = arith.sitofp %161 : vector<128x128xi32> to vector<128x128xf32>
    %c0_27 = arith.constant 0 : index
    %c0_28 = arith.constant 0 : index
    %163 = vector.load %arg4[%c0_27, %c0_28] : memref<24x128xf32, #tpu.memory_space<vmem>>, vector<24x128xf32>
    %cst_29 = arith.constant dense<0.000000e+00> : vector<24x128xf32>
    %164 = tpu.matmul %163, %162, %cst_29 {dimension_numbers = #tpu.dot_dimension_numbers<[1], [0], [0], [1], [0, 0, 1, 1], [], []>, precision = #tpu.contract_precision<fp32>} : vector<24x128xf32>, vector<128x128xf32>, vector<24x128xf32> -> vector<24x128xf32>
    %165 = vector.extract_strided_slice %164 {offsets = [0, 0], sizes = [1, 128], strides = [1, 1]} : vector<24x128xf32> to vector<1x128xf32>
    %166 = vector.extract_strided_slice %164 {offsets = [1, 0], sizes = [1, 128], strides = [1, 1]} : vector<24x128xf32> to vector<1x128xf32>
    %167 = vector.extract_strided_slice %164 {offsets = [2, 0], sizes = [1, 128], strides = [1, 1]} : vector<24x128xf32> to vector<1x128xf32>
    %168 = arith.mulf %165, %39 : vector<1x128xf32>
    %169 = arith.mulf %166, %40 : vector<1x128xf32>
    %170 = arith.addf %168, %169 : vector<1x128xf32>
    %171 = arith.mulf %167, %41 : vector<1x128xf32>
    %172 = arith.addf %170, %171 : vector<1x128xf32>
    %173 = arith.mulf %165, %172 : vector<1x128xf32>
    %174 = arith.subf %0, %173 : vector<1x128xf32>
    %175 = arith.mulf %166, %172 : vector<1x128xf32>
    %176 = arith.subf %1, %175 : vector<1x128xf32>
    %177 = arith.mulf %167, %172 : vector<1x128xf32>
    %178 = arith.subf %2, %177 : vector<1x128xf32>
    %179 = vector.extract_strided_slice %164 {offsets = [3, 0], sizes = [1, 128], strides = [1, 1]} : vector<24x128xf32> to vector<1x128xf32>
    %180 = vector.extract_strided_slice %164 {offsets = [4, 0], sizes = [1, 128], strides = [1, 1]} : vector<24x128xf32> to vector<1x128xf32>
    %181 = vector.extract_strided_slice %164 {offsets = [5, 0], sizes = [1, 128], strides = [1, 1]} : vector<24x128xf32> to vector<1x128xf32>
    %182 = vector.extract_strided_slice %164 {offsets = [6, 0], sizes = [1, 128], strides = [1, 1]} : vector<24x128xf32> to vector<1x128xf32>
    %183 = vector.extract_strided_slice %164 {offsets = [7, 0], sizes = [1, 128], strides = [1, 1]} : vector<24x128xf32> to vector<1x128xf32>
    %184 = vector.extract_strided_slice %164 {offsets = [8, 0], sizes = [1, 128], strides = [1, 1]} : vector<24x128xf32> to vector<1x128xf32>
    %185 = vector.extract_strided_slice %164 {offsets = [9, 0], sizes = [1, 128], strides = [1, 1]} : vector<24x128xf32> to vector<1x128xf32>
    %186 = vector.extract_strided_slice %164 {offsets = [10, 0], sizes = [1, 128], strides = [1, 1]} : vector<24x128xf32> to vector<1x128xf32>
    %187 = vector.extract_strided_slice %164 {offsets = [11, 0], sizes = [1, 128], strides = [1, 1]} : vector<24x128xf32> to vector<1x128xf32>
    %188 = arith.subf %179, %174 : vector<1x128xf32>
    %189 = arith.subf %180, %176 : vector<1x128xf32>
    %190 = arith.subf %181, %178 : vector<1x128xf32>
    %191 = arith.mulf %188, %188 : vector<1x128xf32>
    %192 = arith.mulf %189, %189 : vector<1x128xf32>
    %193 = arith.addf %191, %192 : vector<1x128xf32>
    %194 = arith.mulf %190, %190 : vector<1x128xf32>
    %195 = arith.addf %193, %194 : vector<1x128xf32>
    %196 = math.sqrt %195 : vector<1x128xf32>
    %cst_30 = arith.constant 9.99999993E-9 : f32
    %197 = vector.broadcast %cst_30 : f32 to vector<1x128xf32>
    %198 = arith.maximumf %196, %197 : vector<1x128xf32>
    %199 = arith.divf %188, %198 : vector<1x128xf32>
    %200 = arith.divf %189, %198 : vector<1x128xf32>
    %201 = arith.divf %190, %198 : vector<1x128xf32>
    %202 = arith.subf %182, %174 : vector<1x128xf32>
    %203 = arith.subf %183, %176 : vector<1x128xf32>
    %204 = arith.subf %184, %178 : vector<1x128xf32>
    %205 = arith.mulf %202, %202 : vector<1x128xf32>
    %206 = arith.mulf %203, %203 : vector<1x128xf32>
    %207 = arith.addf %205, %206 : vector<1x128xf32>
    %208 = arith.mulf %204, %204 : vector<1x128xf32>
    %209 = arith.addf %207, %208 : vector<1x128xf32>
    %210 = math.sqrt %209 : vector<1x128xf32>
    %cst_31 = arith.constant 9.99999993E-9 : f32
    %211 = vector.broadcast %cst_31 : f32 to vector<1x128xf32>
    %212 = arith.maximumf %210, %211 : vector<1x128xf32>
    %213 = arith.divf %202, %212 : vector<1x128xf32>
    %214 = arith.divf %203, %212 : vector<1x128xf32>
    %215 = arith.divf %204, %212 : vector<1x128xf32>
    %216 = arith.subf %185, %174 : vector<1x128xf32>
    %217 = arith.subf %186, %176 : vector<1x128xf32>
    %218 = arith.subf %187, %178 : vector<1x128xf32>
    %219 = arith.mulf %216, %216 : vector<1x128xf32>
    %220 = arith.mulf %217, %217 : vector<1x128xf32>
    %221 = arith.addf %219, %220 : vector<1x128xf32>
    %222 = arith.mulf %218, %218 : vector<1x128xf32>
    %223 = arith.addf %221, %222 : vector<1x128xf32>
    %224 = math.sqrt %223 : vector<1x128xf32>
    %cst_32 = arith.constant 9.99999993E-9 : f32
    %225 = vector.broadcast %cst_32 : f32 to vector<1x128xf32>
    %226 = arith.maximumf %224, %225 : vector<1x128xf32>
    %227 = arith.divf %216, %226 : vector<1x128xf32>
    %228 = arith.divf %217, %226 : vector<1x128xf32>
    %229 = arith.divf %218, %226 : vector<1x128xf32>
    %230 = arith.mulf %214, %229 : vector<1x128xf32>
    %231 = arith.mulf %215, %228 : vector<1x128xf32>
    %232 = arith.subf %230, %231 : vector<1x128xf32>
    %233 = arith.mulf %215, %227 : vector<1x128xf32>
    %234 = arith.mulf %213, %229 : vector<1x128xf32>
    %235 = arith.subf %233, %234 : vector<1x128xf32>
    %236 = arith.mulf %213, %228 : vector<1x128xf32>
    %237 = arith.mulf %214, %227 : vector<1x128xf32>
    %238 = arith.subf %236, %237 : vector<1x128xf32>
    %239 = arith.mulf %232, %174 : vector<1x128xf32>
    %240 = arith.mulf %235, %176 : vector<1x128xf32>
    %241 = arith.addf %239, %240 : vector<1x128xf32>
    %242 = arith.mulf %238, %178 : vector<1x128xf32>
    %243 = arith.addf %241, %242 : vector<1x128xf32>
    %cst_33 = arith.constant 0.000000e+00 : f32
    %244 = vector.broadcast %cst_33 : f32 to vector<1x128xf32>
    %245 = arith.cmpf ogt, %243, %244 : vector<1x128xf32>
    %cst_34 = arith.constant 0.000000e+00 : f32
    %246 = vector.broadcast %cst_34 : f32 to vector<1x128xf32>
    %247 = arith.cmpf olt, %243, %246 : vector<1x128xf32>
    %cst_35 = arith.constant -1.000000e+00 : f32
    %cst_36 = arith.constant 0.000000e+00 : f32
    %248 = vector.broadcast %cst_35 : f32 to vector<1x128xf32>
    %249 = vector.broadcast %cst_36 : f32 to vector<1x128xf32>
    %250 = arith.select %247, %248, %249 : vector<1x128xi1>, vector<1x128xf32>
    %cst_37 = arith.constant 1.000000e+00 : f32
    %251 = vector.broadcast %cst_37 : f32 to vector<1x128xf32>
    %252 = arith.select %245, %251, %250 : vector<1x128xi1>, vector<1x128xf32>
    %253 = arith.mulf %232, %232 : vector<1x128xf32>
    %254 = arith.mulf %235, %235 : vector<1x128xf32>
    %255 = arith.addf %253, %254 : vector<1x128xf32>
    %256 = arith.mulf %238, %238 : vector<1x128xf32>
    %257 = arith.addf %255, %256 : vector<1x128xf32>
    %258 = math.sqrt %257 : vector<1x128xf32>
    %259 = arith.mulf %258, %226 : vector<1x128xf32>
    %260 = arith.mulf %259, %212 : vector<1x128xf32>
    %261 = arith.mulf %260, %252 : vector<1x128xf32>
    %262 = arith.mulf %228, %201 : vector<1x128xf32>
    %263 = arith.mulf %229, %200 : vector<1x128xf32>
    %264 = arith.subf %262, %263 : vector<1x128xf32>
    %265 = arith.mulf %229, %199 : vector<1x128xf32>
    %266 = arith.mulf %227, %201 : vector<1x128xf32>
    %267 = arith.subf %265, %266 : vector<1x128xf32>
    %268 = arith.mulf %227, %200 : vector<1x128xf32>
    %269 = arith.mulf %228, %199 : vector<1x128xf32>
    %270 = arith.subf %268, %269 : vector<1x128xf32>
    %271 = arith.mulf %264, %174 : vector<1x128xf32>
    %272 = arith.mulf %267, %176 : vector<1x128xf32>
    %273 = arith.addf %271, %272 : vector<1x128xf32>
    %274 = arith.mulf %270, %178 : vector<1x128xf32>
    %275 = arith.addf %273, %274 : vector<1x128xf32>
    %cst_38 = arith.constant 0.000000e+00 : f32
    %276 = vector.broadcast %cst_38 : f32 to vector<1x128xf32>
    %277 = arith.cmpf ogt, %275, %276 : vector<1x128xf32>
    %cst_39 = arith.constant 0.000000e+00 : f32
    %278 = vector.broadcast %cst_39 : f32 to vector<1x128xf32>
    %279 = arith.cmpf olt, %275, %278 : vector<1x128xf32>
    %cst_40 = arith.constant -1.000000e+00 : f32
    %cst_41 = arith.constant 0.000000e+00 : f32
    %280 = vector.broadcast %cst_40 : f32 to vector<1x128xf32>
    %281 = vector.broadcast %cst_41 : f32 to vector<1x128xf32>
    %282 = arith.select %279, %280, %281 : vector<1x128xi1>, vector<1x128xf32>
    %cst_42 = arith.constant 1.000000e+00 : f32
    %283 = vector.broadcast %cst_42 : f32 to vector<1x128xf32>
    %284 = arith.select %277, %283, %282 : vector<1x128xi1>, vector<1x128xf32>
    %285 = arith.mulf %264, %264 : vector<1x128xf32>
    %286 = arith.mulf %267, %267 : vector<1x128xf32>
    %287 = arith.addf %285, %286 : vector<1x128xf32>
    %288 = arith.mulf %270, %270 : vector<1x128xf32>
    %289 = arith.addf %287, %288 : vector<1x128xf32>
    %290 = math.sqrt %289 : vector<1x128xf32>
    %291 = arith.mulf %290, %198 : vector<1x128xf32>
    %292 = arith.mulf %291, %226 : vector<1x128xf32>
    %293 = arith.mulf %292, %284 : vector<1x128xf32>
    %294 = arith.mulf %200, %215 : vector<1x128xf32>
    %295 = arith.mulf %201, %214 : vector<1x128xf32>
    %296 = arith.subf %294, %295 : vector<1x128xf32>
    %297 = arith.mulf %201, %213 : vector<1x128xf32>
    %298 = arith.mulf %199, %215 : vector<1x128xf32>
    %299 = arith.subf %297, %298 : vector<1x128xf32>
    %300 = arith.mulf %199, %214 : vector<1x128xf32>
    %301 = arith.mulf %200, %213 : vector<1x128xf32>
    %302 = arith.subf %300, %301 : vector<1x128xf32>
    %303 = arith.mulf %296, %174 : vector<1x128xf32>
    %304 = arith.mulf %299, %176 : vector<1x128xf32>
    %305 = arith.addf %303, %304 : vector<1x128xf32>
    %306 = arith.mulf %302, %178 : vector<1x128xf32>
    %307 = arith.addf %305, %306 : vector<1x128xf32>
    %cst_43 = arith.constant 0.000000e+00 : f32
    %308 = vector.broadcast %cst_43 : f32 to vector<1x128xf32>
    %309 = arith.cmpf ogt, %307, %308 : vector<1x128xf32>
    %cst_44 = arith.constant 0.000000e+00 : f32
    %310 = vector.broadcast %cst_44 : f32 to vector<1x128xf32>
    %311 = arith.cmpf olt, %307, %310 : vector<1x128xf32>
    %cst_45 = arith.constant -1.000000e+00 : f32
    %cst_46 = arith.constant 0.000000e+00 : f32
    %312 = vector.broadcast %cst_45 : f32 to vector<1x128xf32>
    %313 = vector.broadcast %cst_46 : f32 to vector<1x128xf32>
    %314 = arith.select %311, %312, %313 : vector<1x128xi1>, vector<1x128xf32>
    %cst_47 = arith.constant 1.000000e+00 : f32
    %315 = vector.broadcast %cst_47 : f32 to vector<1x128xf32>
    %316 = arith.select %309, %315, %314 : vector<1x128xi1>, vector<1x128xf32>
    %317 = arith.mulf %296, %296 : vector<1x128xf32>
    %318 = arith.mulf %299, %299 : vector<1x128xf32>
    %319 = arith.addf %317, %318 : vector<1x128xf32>
    %320 = arith.mulf %302, %302 : vector<1x128xf32>
    %321 = arith.addf %319, %320 : vector<1x128xf32>
    %322 = math.sqrt %321 : vector<1x128xf32>
    %323 = arith.mulf %322, %212 : vector<1x128xf32>
    %324 = arith.mulf %323, %198 : vector<1x128xf32>
    %325 = arith.mulf %324, %316 : vector<1x128xf32>
    %326 = arith.addf %261, %293 : vector<1x128xf32>
    %327 = arith.addf %326, %325 : vector<1x128xf32>
    %328 = arith.divf %261, %327 : vector<1x128xf32>
    %329 = arith.divf %293, %327 : vector<1x128xf32>
    %330 = arith.divf %325, %327 : vector<1x128xf32>
    %331 = vector.extract_strided_slice %164 {offsets = [12, 0], sizes = [1, 128], strides = [1, 1]} : vector<24x128xf32> to vector<1x128xf32>
    %332 = vector.extract_strided_slice %164 {offsets = [13, 0], sizes = [1, 128], strides = [1, 1]} : vector<24x128xf32> to vector<1x128xf32>
    %333 = vector.extract_strided_slice %164 {offsets = [14, 0], sizes = [1, 128], strides = [1, 1]} : vector<24x128xf32> to vector<1x128xf32>
    %334 = vector.extract_strided_slice %164 {offsets = [15, 0], sizes = [1, 128], strides = [1, 1]} : vector<24x128xf32> to vector<1x128xf32>
    %335 = vector.extract_strided_slice %164 {offsets = [16, 0], sizes = [1, 128], strides = [1, 1]} : vector<24x128xf32> to vector<1x128xf32>
    %336 = vector.extract_strided_slice %164 {offsets = [17, 0], sizes = [1, 128], strides = [1, 1]} : vector<24x128xf32> to vector<1x128xf32>
    %337 = vector.extract_strided_slice %164 {offsets = [18, 0], sizes = [1, 128], strides = [1, 1]} : vector<24x128xf32> to vector<1x128xf32>
    %338 = vector.extract_strided_slice %164 {offsets = [19, 0], sizes = [1, 128], strides = [1, 1]} : vector<24x128xf32> to vector<1x128xf32>
    %339 = vector.extract_strided_slice %164 {offsets = [20, 0], sizes = [1, 128], strides = [1, 1]} : vector<24x128xf32> to vector<1x128xf32>
    %340 = vector.extract_strided_slice %164 {offsets = [21, 0], sizes = [1, 128], strides = [1, 1]} : vector<24x128xf32> to vector<1x128xf32>
    %341 = vector.extract_strided_slice %164 {offsets = [22, 0], sizes = [1, 128], strides = [1, 1]} : vector<24x128xf32> to vector<1x128xf32>
    %342 = vector.extract_strided_slice %164 {offsets = [23, 0], sizes = [1, 128], strides = [1, 1]} : vector<24x128xf32> to vector<1x128xf32>
    %343 = arith.mulf %328, %334 : vector<1x128xf32>
    %344 = arith.mulf %329, %337 : vector<1x128xf32>
    %345 = arith.addf %343, %344 : vector<1x128xf32>
    %346 = arith.mulf %330, %340 : vector<1x128xf32>
    %347 = arith.addf %345, %346 : vector<1x128xf32>
    %348 = arith.mulf %331, %172 : vector<1x128xf32>
    %349 = arith.addf %347, %348 : vector<1x128xf32>
    %350 = arith.mulf %328, %335 : vector<1x128xf32>
    %351 = arith.mulf %329, %338 : vector<1x128xf32>
    %352 = arith.addf %350, %351 : vector<1x128xf32>
    %353 = arith.mulf %330, %341 : vector<1x128xf32>
    %354 = arith.addf %352, %353 : vector<1x128xf32>
    %355 = arith.mulf %332, %172 : vector<1x128xf32>
    %356 = arith.addf %354, %355 : vector<1x128xf32>
    %357 = arith.mulf %328, %336 : vector<1x128xf32>
    %358 = arith.mulf %329, %339 : vector<1x128xf32>
    %359 = arith.addf %357, %358 : vector<1x128xf32>
    %360 = arith.mulf %330, %342 : vector<1x128xf32>
    %361 = arith.addf %359, %360 : vector<1x128xf32>
    %362 = arith.mulf %333, %172 : vector<1x128xf32>
    %363 = arith.addf %361, %362 : vector<1x128xf32>
    %364 = tpu.concatenate %349, %356, %363 in 0 : vector<1x128xf32>, vector<1x128xf32>, vector<1x128xf32> -> vector<3x128xf32>
    %c0_48 = arith.constant 0 : index
    %c0_49 = arith.constant 0 : index
    %365 = vector.load %arg5[%c0_48, %c0_49] : memref<3x128xf32, #tpu.memory_space<vmem>>, vector<3x128xf32>
    tpu.vector_store %arg5[%c0_48, %c0_49], %364 {strides = array<i32>} : memref<3x128xf32, #tpu.memory_space<vmem>>, vector<3x128xf32>,
    return
  }
  func.func @transform_0(%arg0: i32) -> (i32, i32) {
    %c0_i32 = arith.constant 0 : i32
    %c0_i32_0 = arith.constant 0 : i32
    return %c0_i32, %arg0 : i32, i32
  }
  func.func @transform_1(%arg0: i32) -> (i32, i32) {
    %c0_i32 = arith.constant 0 : i32
    %c0_i32_0 = arith.constant 0 : i32
    %c0_i32_1 = arith.constant 0 : i32
    return %c0_i32, %c0_i32_0 : i32, i32
  }
  func.func @transform_2(%arg0: i32) -> (i32, i32) {
    %c0_i32 = arith.constant 0 : i32
    %c0_i32_0 = arith.constant 0 : i32
    %c0_i32_1 = arith.constant 0 : i32
    return %c0_i32, %c0_i32_0 : i32, i32
  }
  func.func @transform_3(%arg0: i32) -> (i32, i32) {
    %c0_i32 = arith.constant 0 : i32
    %c0_i32_0 = arith.constant 0 : i32
    %c0_i32_1 = arith.constant 0 : i32
    return %c0_i32, %c0_i32_0 : i32, i32
  }
  func.func @transform_4(%arg0: i32) -> (i32, i32) {
    %c0_i32 = arith.constant 0 : i32
    %c0_i32_0 = arith.constant 0 : i32
    return %c0_i32, %arg0 : i32, i32
  }
}

</mosaic_0001>

<bundles_post_ra>
// kernel: tpu_custom_call.1
= control target key start
LH: loop header
LB: loop body
LE: loop exit
PB: predicated region body
PF: predicated region fallthrough
CT: control target
= control target key end

     0   :  { %9 = vsyncpa [#allocation3], 0  ;;  %s6028_s0 = inlined_call_operand.vmem [shape: f32[3,256], index: 0, kind: input, shape index: {}]   ;;  %s6029_s1 = inlined_call_operand.vmem [shape: f32[128,3], index: 1, kind: input, shape index: {}]   ;;  %s6030_s2 = inlined_call_operand.vmem [shape: f32[32,128], index: 2, kind: input, shape index: {}]   ;;  %s6031_s3 = inlined_call_operand.vmem [shape: f32[24,128], index: 3, kind: input, shape index: {}]   ;;  %s6032_s4 = inlined_call_operand.hbm [shape: f32[3,256], index: 4, kind: output, shape index: {}]  }
   0x1   :  { %11 = vsyncpa [#allocation3 + $0x1], 0  ;;  %s4376_s15 = smov 0   ;;  %s4378_s16 = smov 0  }
   0x2   :  { %s4380_s17 = smov 0   ;;  %s4382_s18 = smov 0  }
   0x3 LB: > { %s4397_s19 = sadd.s32 4294967295, %s4341_s18   ;;  %s2944_s20 = sadd.s32 4294967294, %s4341_s18   ;;  %s4341_s18 = sphi %s4382_s18, %s6212_s18   ;;  %s4337_s17 = sphi %s4380_s17, %s6211_s17   ;;  %s4333_s16 = sphi %s4378_s16, %s6210_s16   ;;  %s4329_s15 = sphi %s4376_s15, %s6209_s15  }
   0x4   : > { %s4401_s21 = sadd.s32 1, %s4341_s18   ;;  %s113_s22 = sadd.s32 1, %s4337_s17 }
   0x5   : > { %s110_s23 = ssub.s32 %s4341_s18, %s4401_s21  ;;  %p123_p0 = scmp.ne.s32.totalorder %s4337_s17, %s4333_s16 }
   0x6   : > { %p111_p1 = scmp.eq.s32.totalorder %s110_s23, 0  ;;  %p124_p2 = scmp.eq.s32.totalorder %s4397_s19, 1 }
   0x7   : > { %p129_p3 = scmp.ne.s32.totalorder %s4333_s16, %s4329_s15  ;;  %p130_p4 = scmp.eq.s32.totalorder %s2944_s20, 1 }
   0x8   : > { %s4412_s24 = scalar_select %p111_p1, %s4337_s17, %s113_s22  }
   0x9   : > { %p4414_p5 = por %p124_p2, %p123_p0  ;;  %p4418_p6 = por %p130_p4, %p129_p3 }
   0xa   : > { %p2947_p7 = scmp.ge.s32.totalorder %s4341_s18, 1  ;;  %p164_p8 = scmp.lt.s32.totalorder %s4341_s18, 3 }
   0xc   : > { %p165_p9 = pnand %p2947_p7, %p164_p8 }
   0xe   : > { %168 = sbr.rel (%p165_p9) target bundleno = 1352 (0x548), region = 36 }
  0x15   : > { %v198_v0 = vld [vmem:[%s6029_s1 + $0x10] sm:$0xff]  ;;  %v196_v1 = vld [vmem:[%s6029_s1] sm:$0xff]  ;;  %v4343_v2 = vmov 0   ;;  %v199_v3 = vld [vmem:[%s6029_s1 + $0x18] sm:$0xff]  ;;  %v4344_v10 = vmov 1   ;;  %v4345_v17 = vmov 2   ;;  %v292_v19 = vlaneseq }
  0x16   : > { %4223 = vset.pattern.permute.xlu1 %v4343_v2  ;;  %4222 = vset.pattern.permute.xlu0 %v4343_v2  ;;  %v197_v4 = vld [vmem:[%s6029_s1 + $0x8] sm:$0xff]  ;;  %v200_v6 = vld [vmem:[%s6029_s1 + $0x20] sm:$0xff]  ;;  %v203_v7 = vld [vmem:[%s6029_s1 + $0x38] sm:$0xff]  ;;  %p189_p10 = scmp.lt.s32.totalorder %s4397_s19, 1  ;;  %s186_s27 = sand.u32 1, %s4333_s16  }
  0x17   : > { %224 = vperm.xlu1 %4223, %v198_v0   ;;  %214 = vperm.xlu0 %4222, %v196_v1   ;;  %v201_v5 = vld [vmem:[%s6029_s1 + $0x28] sm:$0xff]  ;;  %v202_v8 = vld [vmem:[%s6029_s1 + $0x30] sm:$0xff]  ;;  %v208_v11 = vld [vmem:[%s6029_s1 + $0x60] sm:$0xff]  ;;  %v4474_v22 = vshrl.u32 %v292_v19, 7  ;;  %s2948_s28 = sshll.u32 %s186_s27, 2  ;;  %s4350_s10 = smov [#allocation2]  }
  0x18   : > { %v205_v9 = vld [vmem:[%s6029_s1 + $0x48] sm:$0xff]  ;;  %v211_v12 = vld [vmem:[%s6029_s1 + $0x78] sm:$0xff]  ;;  %v204_v13 = vld [vmem:[%s6029_s1 + $0x40] sm:$0xff]  ;;  %s190_s22 = scalar_select %p189_p10, %s4397_s19, 1 }
  0x19   : > { %v206_v14 = vld [vmem:[%s6029_s1 + $0x50] sm:$0xff]  ;;  %v207_v15 = vld [vmem:[%s6029_s1 + $0x58] sm:$0xff]  ;;  %v209_v16 = vld [vmem:[%s6029_s1 + $0x68] sm:$0xff]  ;;  %6093 = vst [vmem:[#allocation5_spill] sm:$0xff] %v4474_v22  ;;  %s188_s30 = scalar_lea.vmem [#allocation2], %s2948_s28  ;;  %s4283_s11 = sshll.u32 %s4350_s10, 4  ;;  %s4284_s11 = int_to_ptr.vmem [resolvable:$false] %s4283_s11 }
  0x1a   : > { %v210_v18 = vld [vmem:[%s6029_s1 + $0x70] sm:$0xff]  ;;  %s2949_s23 = sshll.u32 %s190_s22, 2  ;;  %s2885_s5 = sshll.u32 %s188_s30, 4  ;;  %s5986_s5 = int_to_ptr.vmem [resolvable:$true] %s2885_s5 }
  0x1b   : > { %229 = vperm.xlu1 %4223, %v199_v3   ;;  %219 = vperm.xlu0 %4222, %v197_v4   ;;  %s4479_s29 = scalar_lea.vmem %s6028_s0, %s2949_s23  ;;  %s4279_s9 = scalar_lea.vmem %s5986_s5, 64 }
  0x1c   : > { %v4483_v28 = vld [vmem:[%s4479_s29] ss:$0 sm:$0xff]  ;;  %v4486_v29 = vld [vmem:[%s4479_s29 + $0x1] ss:$0 sm:$0xff]  ;;  %p4280_p11 = scmp.ne.s32.totalorder %s5986_s5, %s4279_s9  ;;  %s4285_s12 = scalar_lea.vmem %s4284_s11, 128 }
  0x1d   : > { %p4286_p0 = scmp.lt.s32.totalorder %s5986_s5, %s4284_s11  ;;  %p4287_p1 = scmp.lt.s32.totalorder %s4285_s12, %s4279_s9 }
  0x1e   : > { %p4281_p12 = pnand %p4280_p11, %p4414_p5 }
  0x1f   : > { %239 = vperm.xlu1 %4223, %v201_v5   ;;  %234 = vperm.xlu0 %4222, %v200_v6   ;;  %p4288_p2 = por %p4287_p1, %p4286_p0 }
  0x20   : > { %p4282_p13 = pneg %p4281_p12 }
  0x22   : > { %p4289_p3 = pnand %p4288_p2, %p4282_p13 }
  0x23   : > { %249 = vperm.xlu1 %4223, %v203_v7   ;;  %244 = vperm.xlu0 %4222, %v202_v8  }
  0x27   : > { %4224 = vset.pattern.permute.xlu1 %v4344_v10  ;;  %259 = vperm.xlu0 %4222, %v205_v9  }
  0x28   : > { %317 = vperm.xlu1 %4224, %v197_v4  }
  0x2b   : > { %274 = vperm.xlu0 %4222, %v208_v11  }
  0x2c   : > { %321 = vperm.xlu1 %4224, %v198_v0  }
  0x2f   : > { %289 = vperm.xlu0 %4222, %v211_v12  }
  0x30   : > { %329 = vperm.xlu1 %4224, %v200_v6  }
  0x33   : > { %4229 = vset.pattern.permute.xlu0 %v4344_v10 }
  0x34   : > { %337 = vperm.xlu1 %4224, %v202_v8   ;;  %313 = vperm.xlu0 %4229, %v196_v1  }
  0x38   : > { %4225 = vset.pattern.permute.xlu1 %v4343_v2  ;;  %325 = vperm.xlu0 %4229, %v199_v3  }
  0x39   : > { %254 = vperm.xlu1 %4225, %v204_v13  }
  0x3c   : > { %333 = vperm.xlu0 %4229, %v201_v5  }
  0x3d   : > { %264 = vperm.xlu1 %4225, %v206_v14  }
  0x40   : > { %341 = vperm.xlu0 %4229, %v203_v7  }
  0x41   : > { %269 = vperm.xlu1 %4225, %v207_v15  }
  0x44   : > { %345 = vperm.xlu0 %4229, %v204_v13  }
  0x45   : > { %4226 = vset.pattern.permute.xlu1 %v4344_v10 }
  0x46   : > { %349 = vperm.xlu1 %4226, %v205_v9  }
  0x48   : > { %357 = vperm.xlu0 %4229, %v207_v15  }
  0x4a   : > { %353 = vperm.xlu1 %4226, %v206_v14  }
  0x4c   : > { %365 = vperm.xlu0 %4229, %v209_v16  }
  0x4e   : > { %4227 = vset.pattern.permute.xlu1 %v4345_v17 }
  0x4f   : > { %397 = vperm.xlu1 %4227, %v196_v1   ;;  %v4517_v1 = vld [vmem:[%s4479_s29 + $0x2] ss:$0 sm:$0xff] }
  0x50   : > { %4231 = vset.pattern.permute.xlu0 %v4345_v17 }
  0x51   : > { %401 = vperm.xlu0 %4231, %v197_v4  }
  0x53   : > { %405 = vperm.xlu1 %4227, %v198_v0  }
  0x55   : > { %413 = vperm.xlu0 %4231, %v200_v6  }
  0x57   : > { %409 = vperm.xlu1 %4227, %v199_v3  }
  0x59   : > { %421 = vperm.xlu0 %4231, %v202_v8  }
  0x5b   : > { %417 = vperm.xlu1 %4227, %v201_v5  }
  0x5d   : > { %429 = vperm.xlu0 %4231, %v204_v13  }
  0x5f   : > { %425 = vperm.xlu1 %4227, %v203_v7  }
  0x61   : > { %441 = vperm.xlu0 %4231, %v207_v15  }
  0x63   : > { %4228 = vset.pattern.permute.xlu1 %v4343_v2 }
  0x64   : > { %279 = vperm.xlu1 %4228, %v209_v16  }
  0x65   : > { %449 = vperm.xlu0 %4231, %v209_v16  }
  0x68   : > { %284 = vperm.xlu1 %4228, %v210_v18  }
  0x69   : > { %457 = vperm.xlu0 %4231, %v211_v12  }
  0x6c   : > { %4230 = vset.pattern.permute.xlu1 %v4344_v10 }
  0x6d   : > { %361 = vperm.xlu1 %4230, %v208_v11  }
  0x71   : > { %369 = vperm.xlu1 %4230, %v210_v18  }
  0x75   : > { %373 = vperm.xlu1 %4230, %v211_v12  }
  0x79   : > { %4232 = vset.pattern.permute.xlu1 %v4345_v17 }
  0x7a   : > { %433 = vperm.xlu1 %4232, %v205_v9  }
  0x7e   : > { %437 = vperm.xlu1 %4232, %v206_v14  }
  0x82   : > { %445 = vperm.xlu1 %4232, %v208_v11  }
  0x86   : > { %453 = vperm.xlu1 %4232, %v210_v18  }
  0x96   : > { %v225_v20 = vpop.permute.xlu1 %224  ;;  %v215_v21 = vpop.permute.xlu0 %214 }
  0x97   : > { %v298_v37 = vsub.f32 %v225_v20, %v4483_v28  ;;  %v296_v4 = vsub.f32 %v215_v21, %v4483_v28 }
  0x99   : > { %v482_v44 = vmul.f32 %v298_v37, %v298_v37  ;;  %v480_v12 = vmul.f32 %v296_v4, %v296_v4 }
  0x9a   : > { %v230_v23 = vpop.permute.xlu1 %229  ;;  %v220_v24 = vpop.permute.xlu0 %219 }
  0x9b   : > { %v297_v32 = vsub.f32 %v220_v24, %v4483_v28  ;;  %v299_v7 = vsub.f32 %v230_v23, %v4483_v28 }
  0x9d   : > { %v481_v35 = vmul.f32 %v297_v32, %v297_v32  ;;  %v483_v18 = vmul.f32 %v299_v7, %v299_v7 }
  0x9e   : > { %v240_v26 = vpop.permute.xlu1 %239  ;;  %v235_v27 = vpop.permute.xlu0 %234 }
  0x9f   : > { %v300_v41 = vsub.f32 %v235_v27, %v4483_v28  ;;  %v301_v13 = vsub.f32 %v240_v26, %v4483_v28 }
  0xa1   : > { %v484_v48 = vmul.f32 %v300_v41, %v300_v41  ;;  %v485_v32 = vmul.f32 %v301_v13, %v301_v13 }
  0xa2   : > { %v4488_v30 = vpop.permute.xlu1 %249  ;;  %v245_v31 = vpop.permute.xlu0 %244 }
  0xa3   : > { %v302_v9 = vsub.f32 %v245_v31, %v4483_v28 }
  0xa5   : > { %v486_v21 = vmul.f32 %v302_v9, %v302_v9 }
  0xa6   : > { %v4491_v33 = vpop.permute.xlu0 %259 }
  0xa7   : > { %v318_v34 = vpop.permute.xlu1 %317 }
  0xa8   : > { %v381_v36 = vsub.f32 %v318_v34, %v4486_v29 }
  0xaa   : > { %v497_v38 = vmul.f32 %v381_v36, %v381_v36  ;;  %v4495_v39 = vpop.permute.xlu0 %274 }
  0xab   : > { %v322_v40 = vpop.permute.xlu1 %321 }
  0xac   : > { %v4498_v42 = vadd.f32 %v497_v38, %v481_v35  ;;  %v382_v43 = vsub.f32 %v322_v40, %v4486_v29 }
  0xae   : > { %v498_v45 = vmul.f32 %v382_v43, %v382_v43  ;;  %v4501_v46 = vpop.permute.xlu0 %289  ;;  %v303_v43 = vsub.f32 %v4488_v30, %v4483_v28 }
  0xaf   : > { %v330_v47 = vpop.permute.xlu1 %329 }
  0xb0   : > { %v4503_v49 = vadd.f32 %v498_v45, %v482_v44  ;;  %v384_v50 = vsub.f32 %v330_v47, %v4486_v29 }
  0xb2   : > { %v500_v51 = vmul.f32 %v384_v50, %v384_v50 }
  0xb3   : > { %v338_v52 = vpop.permute.xlu1 %337  ;;  %v314_v53 = vpop.permute.xlu0 %313 }
  0xb4   : > { %v516_v54 = vadd.f32 %v500_v51, %v484_v48  ;;  %v380_v5 = vsub.f32 %v314_v53, %v4486_v29  ;;  %v386_v10 = vsub.f32 %v338_v52, %v4486_v29 }
  0xb6   : > { %v496_v14 = vmul.f32 %v380_v5, %v380_v5  ;;  %v502_v23 = vmul.f32 %v386_v10, %v386_v10  ;;  %v715_v5 = vld [vmem:[%s6030_s2] sm:$0xff]  ;;  %v487_v10 = vmul.f32 %v303_v43, %v303_v43 }
  0xb7   : > { %v326_v55 = vpop.permute.xlu0 %325  ;;  %v4556_v9 = vand.u32 4294901760, %v715_v5 }
  0xb8   : > { %v255_v56 = vpop.permute.xlu1 %254  ;;  %v512_v34 = vadd.f32 %v496_v14, %v480_v12  ;;  %v383_v26 = vsub.f32 %v326_v55, %v4486_v29  ;;  %v518_v48 = vadd.f32 %v502_v23, %v486_v21 }
  0xb9   : > { %v304_v36 = vsub.f32 %v255_v56, %v4483_v28 }
  0xba   : > { %v499_v55 = vmul.f32 %v383_v26, %v383_v26 }
  0xbb   : > { %v334_v57 = vpop.permute.xlu0 %333  ;;  %v488_v30 = vmul.f32 %v304_v36, %v304_v36 }
  0xbc   : > { %v4506_v58 = vpop.permute.xlu1 %264  ;;  %v385_v15 = vsub.f32 %v334_v57, %v4486_v29 }
  0xbe   : > { %v501_v37 = vmul.f32 %v385_v15, %v385_v15 }
  0xbf   : > { %v342_v59 = vpop.permute.xlu0 %341 }
  0xc0   : > { %v4508_v60 = vpop.permute.xlu1 %269  ;;  %v387_v38 = vsub.f32 %v342_v59, %v4486_v29 }
  0xc3   : > { %v346_v61 = vpop.permute.xlu0 %345 }
  0xc4   : > { %v388_v24 = vsub.f32 %v346_v61, %v4486_v29  ;;  %v517_v61 = vadd.f32 %v501_v37, %v485_v32 }
  0xc5   : > { %v4510_v62 = vpop.permute.xlu1 %349 }
  0xc6   : > { %v504_v50 = vmul.f32 %v388_v24, %v388_v24 }
  0xc7   : > { %v4512_v63 = vpop.permute.xlu0 %357 }
  0xc9   : > { %v4514_v0 = vpop.permute.xlu1 %353 }
  0xcb   : > { %v4519_v2 = vpop.permute.xlu0 %365 }
  0xce   : > { %v398_v3 = vpop.permute.xlu1 %397 }
  0xcf   : > { %v464_v8 = vsub.f32 %v398_v3, %v4517_v1  ;;  %v503_v3 = vmul.f32 %v387_v38, %v387_v38 }
  0xd0   : > { %v402_v6 = vpop.permute.xlu0 %401 }
  0xd1   : > { %v528_v19 = vmul.f32 %v464_v8, %v464_v8  ;;  %v465_v27 = vsub.f32 %v402_v6, %v4517_v1  ;;  %v519_v21 = vadd.f32 %v503_v3, %v487_v10 }
  0xd2   : > { %v406_v11 = vpop.permute.xlu1 %405 }
  0xd3   : > { %v466_v16 = vsub.f32 %v406_v11, %v4517_v1  ;;  %v4538_v44 = vadd.f32 %v528_v19, %v512_v34  ;;  %v529_v51 = vmul.f32 %v465_v27, %v465_v27  ;;  %v520_v11 = vadd.f32 %v504_v50, %v488_v30 }
  0xd4   : > { %v414_v17 = vpop.permute.xlu0 %413  ;;  %v515_v19 = vadd.f32 %v499_v55, %v483_v18  ;;  %v390_v50 = vsub.f32 %v4514_v0, %v4486_v29  ;;  %v311_v55 = vsub.f32 %v4501_v46, %v4483_v28  ;;  %v391_v0 = vsub.f32 %v4512_v63, %v4486_v29 }
  0xd5   : > { %v468_v20 = vsub.f32 %v414_v17, %v4517_v1  ;;  %v530_v40 = vmul.f32 %v466_v16, %v466_v16  ;;  %v4559_v12 = vadd.f32 %v529_v51, %v4498_v42  ;;  %v308_v51 = vsub.f32 %v4495_v39, %v4483_v28 }
  0xd6   : > { %v410_v31 = vpop.permute.xlu1 %409  ;;  %v506_v30 = vmul.f32 %v390_v50, %v390_v50  ;;  %v495_v63 = vmul.f32 %v311_v55, %v311_v55 }
  0xd7   : > { %v532_v35 = vmul.f32 %v468_v20, %v468_v20  ;;  %v467_v52 = vsub.f32 %v410_v31, %v4517_v1  ;;  %v4567_v20 = vsub.f32 %v715_v5, %v4556_v9  ;;  %v307_v5 = vsub.f32 %v4508_v60, %v4483_v28 }
  0xd8   : > { %v422_v41 = vpop.permute.xlu0 %421 }
  0xd9   : > { %v4540_v45 = vadd.f32 %v532_v35, %v516_v54  ;;  %v470_v47 = vsub.f32 %v422_v41, %v4517_v1  ;;  %v4548_v54 = vadd.f32 %v530_v40, %v4503_v49  ;;  %v531_v13 = vmul.f32 %v467_v52, %v467_v52 }
  0xda   : > { %v418_v53 = vpop.permute.xlu1 %417  ;;  %v6036_v27 = vand.u32 4294901760, %v4567_v20  ;;  %v306_v52 = vsub.f32 %v4506_v58, %v4483_v28  ;;  %v393_v58 = vsub.f32 %v4519_v2, %v4486_v29 }
  0xdb   : > { %v593_v56 = vmin.f32 %v4538_v44, %v4540_v45  ;;  %v534_v57 = vmul.f32 %v470_v47, %v470_v47  ;;  %v469_v59 = vsub.f32 %v418_v53, %v4517_v1  ;;  %v4574_v31 = vadd.f32 %v531_v13, %v515_v19 }
  0xdc   : > { %v430_v4 = vpop.permute.xlu0 %429  ;;  %v803_v26 = vsub.f32 %v4567_v20, %v6036_v27  ;;  %v389_v47 = vsub.f32 %v4510_v62, %v4486_v29 }
  0xdd   : > { %v4553_v6 = vadd.f32 %v534_v57, %v518_v48  ;;  %v533_v7 = vmul.f32 %v469_v59, %v469_v59  ;;  %v472_v8 = vsub.f32 %v430_v4, %v4517_v1  ;;  %v305_v48 = vsub.f32 %v4491_v33, %v4483_v28 }
  0xde   : > { %v426_v49 = vpop.permute.xlu1 %425  ;;  %v804_v36 = vand.u32 4294901760, %v803_v26  ;;  %v490_v4 = vmul.f32 %v306_v52, %v306_v52 }
  0xdf   : > { %v595_v14 = vmin.f32 %v4548_v54, %v4553_v6  ;;  %v4563_v15 = vadd.f32 %v533_v7, %v517_v61  ;;  %v536_v16 = vmul.f32 %v472_v8, %v472_v8  ;;  %v471_v17 = vsub.f32 %v426_v49, %v4517_v1 }
  0xe0   : > { %3348 = vmatprep.mubr.f32.mxu0 %v804_v36  ;;  %v442_v41 = vpop.permute.xlu0 %441  ;;  %v489_v33 = vmul.f32 %v305_v48, %v305_v48  ;;  %v492_v61 = vmul.f32 %v308_v51, %v308_v51  ;;  %v491_v36 = vmul.f32 %v307_v5, %v307_v5 }
  0xe1   : > { %v594_v23 = vmin.f32 %v4559_v12, %v4563_v15  ;;  %v4571_v42 = vadd.f32 %v536_v16, %v520_v11  ;;  %v535_v24 = vmul.f32 %v471_v17, %v471_v17  ;;  %v475_v7 = vsub.f32 %v442_v41, %v4517_v1 }
  0xe2   : > { %v507_v16 = vmul.f32 %v391_v0, %v391_v0  ;;  %v522_v17 = vadd.f32 %v506_v30, %v490_v4 }
  0xe3   : > { %v4577_v32 = vmin.f32 %v593_v56, %v4571_v42  ;;  %v4579_v34 = vadd.f32 %v535_v24, %v519_v21  ;;  %v280_v18 = vpop.permute.xlu1 %279  ;;  %v505_v56 = vmul.f32 %v389_v47, %v389_v47  ;;  %v509_v24 = vmul.f32 %v393_v58, %v393_v58 }
  0xe4   : > { %v309_v57 = vsub.f32 %v280_v18, %v4483_v28  ;;  %v450_v62 = vpop.permute.xlu0 %449 }
  0xe5   : > { %v596_v35 = vmin.f32 %v4574_v31, %v4579_v34  ;;  %v477_v8 = vsub.f32 %v450_v62, %v4517_v1  ;;  %v521_v11 = vadd.f32 %v505_v56, %v489_v33 }
  0xe6   : > { %v493_v13 = vmul.f32 %v309_v57, %v309_v57 }
  0xe7   : > { %v285_v37 = vpop.permute.xlu1 %284  ;;  %v541_v41 = vmul.f32 %v477_v8, %v477_v8 }
  0xe8   : > { %v458_v19 = vpop.permute.xlu0 %457  ;;  %v525_v48 = vadd.f32 %v509_v24, %v493_v13  ;;  %v569_v24 = vadd.s32 64, %v4474_v22 }
  0xe9   : > { %v479_v50 = vsub.f32 %v458_v19, %v4517_v1  ;;  %v567_v19 = vadd.s32 48, %v4474_v22 }
  0xea   : > { %v4629_v33 = vadd.f32 %v541_v41, %v525_v48  ;;  %v576_v48 = vadd.s32 120, %v4474_v22 }
  0xeb   : > { %v543_v0 = vmul.f32 %v479_v50, %v479_v50  ;;  %v4663_v50 = vcvt.s32.f32 %v4474_v22 }
  0xec   : > { %v362_v38 = vpop.permute.xlu1 %361 }
  0xed   : > { %v392_v39 = vsub.f32 %v362_v38, %v4486_v29  ;;  %v539_v38 = vmul.f32 %v475_v7, %v475_v7  ;;  %6094 = vst [vmem:[#allocation6_spill] sm:$0xff] %v4663_v50 }
  0xef   : > { %v508_v2 = vmul.f32 %v392_v39, %v392_v39 }
  0xf0   : > { %v370_v40 = vpop.permute.xlu1 %369 }
  0xf1   : > { %v394_v21 = vsub.f32 %v370_v40, %v4486_v29 }
  0xf3   : > { %v510_v40 = vmul.f32 %v394_v21, %v394_v21  ;;  %v568_v21 = vadd.s32 56, %v4474_v22 }
  0xf4   : > { %v374_v43 = vpop.permute.xlu1 %373 }
  0xf5   : > { %v395_v3 = vsub.f32 %v374_v43, %v4486_v29  ;;  %v310_v43 = vsub.f32 %v285_v37, %v4483_v28  ;;  %v524_v29 = vadd.f32 %v508_v2, %v492_v61 }
  0xf7   : > { %v511_v18 = vmul.f32 %v395_v3, %v395_v3  ;;  %v494_v62 = vmul.f32 %v310_v43, %v310_v43  ;;  %v574_v43 = vadd.s32 104, %v4474_v22 }
  0xf9   : > { %v434_v53 = vpop.permute.xlu1 %433  ;;  %v527_v55 = vadd.f32 %v511_v18, %v495_v63  ;;  %v526_v61 = vadd.f32 %v510_v40, %v494_v62  ;;  %v570_v18 = vadd.s32 72, %v4474_v22  ;;  %v4687_v62 = vcvt.s32.f32 %v569_v24 }
  0xfa   : > { %v473_v59 = vsub.f32 %v434_v53, %v4517_v1  ;;  %v523_v53 = vadd.f32 %v507_v16, %v491_v36  ;;  %v564_v16 = vadd.s32 24, %v4474_v22  ;;  %v572_v36 = vadd.s32 88, %v4474_v22 }
  0xfb   : > { %v4634_v58 = vadd.f32 %v543_v0, %v527_v55  ;;  %6102 = vst [vmem:[#allocation14_spill] sm:$0xff] %v4687_v62 }
  0xfc   : > { %v537_v46 = vmul.f32 %v473_v59, %v473_v59  ;;  %v4627_v57 = vadd.f32 %v539_v38, %v523_v53  ;;  %v573_v38 = vadd.s32 96, %v4474_v22 }
  0xfd   : > { %v438_v10 = vpop.permute.xlu1 %437 }
  0xfe   : > { %v474_v49 = vsub.f32 %v438_v10, %v4517_v1  ;;  %v4612_v26 = vadd.f32 %v537_v46, %v521_v11  ;;  %v600_v46 = vmin.f32 %v596_v35, %v4627_v57  ;;  %v565_v35 = vadd.s32 32, %v4474_v22 }
 0x100   : > { %v538_v60 = vmul.f32 %v474_v49, %v474_v49  ;;  %v598_v56 = vmin.f32 %v594_v23, %v4612_v26  ;;  %v604_v7 = vmin.f32 %v600_v46, %v4634_v58  ;;  %v563_v49 = vadd.s32 16, %v4474_v22 }
 0x101   : > { %v446_v47 = vpop.permute.xlu1 %445  ;;  %v4671_v55 = vcvt.s32.f32 %v565_v35 }
 0x102   : > { %v4616_v51 = vadd.f32 %v538_v60, %v522_v17  ;;  %v476_v52 = vsub.f32 %v446_v47, %v4517_v1  ;;  %v602_v23 = vmin.f32 %v598_v56, %v4629_v33  ;;  %v566_v17 = vadd.s32 40, %v4474_v22 }
 0x103   : > { %v571_v60 = vadd.s32 80, %v4474_v22  ;;  %v575_v47 = vadd.s32 112, %v4474_v22  ;;  %v4667_v53 = vcvt.s32.f32 %v563_v49  ;;  %6098 = vst [vmem:[#allocation10_spill] sm:$0xff] %v4671_v55 }
 0x104   : > { %v599_v28 = vmin.f32 %v595_v14, %v4616_v51  ;;  %v540_v37 = vmul.f32 %v476_v52, %v476_v52  ;;  %v4673_v56 = vcvt.s32.f32 %v566_v17 }
 0x105   : > { %v454_v59 = vpop.permute.xlu1 %453  ;;  %6096 = vst [vmem:[#allocation8_spill] sm:$0xff] %v4667_v53  ;;  %v4693_v0 = vcvt.s32.f32 %v571_v60 }
 0x106   : > { %v4631_v30 = vadd.f32 %v540_v37, %v524_v29  ;;  %v478_v39 = vsub.f32 %v454_v59, %v4517_v1  ;;  %v4669_v29 = vcvt.s32.f32 %v564_v16  ;;  %6099 = vst [vmem:[#allocation11_spill] sm:$0xff] %v4673_v56  ;;  %v4677_v37 = vcvt.s32.f32 %v568_v21 }
 0x107   : > { %v4689_v59 = vcvt.s32.f32 %v570_v18  ;;  %6104 = vst [vmem:[#allocation16_spill] sm:$0xff] %v4693_v0 }
 0x108   : > { %v601_v14 = vmin.f32 %v4577_v32, %v4631_v30  ;;  %v542_v3 = vmul.f32 %v478_v39, %v478_v39  ;;  %v562_v32 = vadd.s32 8, %v4474_v22  ;;  %6097 = vst [vmem:[#allocation9_spill] sm:$0xff] %v4669_v29  ;;  %6101 = vst [vmem:[#allocation13_spill] sm:$0xff] %v4677_v37  ;;  %v4695_v39 = vcvt.s32.f32 %v572_v36 }
 0x109   : > { %6103 = vst [vmem:[#allocation15_spill] sm:$0xff] %v4689_v59 }
 0x10a   : > { %v605_v4 = vmin.f32 %v601_v14, %v602_v23  ;;  %v4643_v5 = vadd.f32 %v542_v3, %v526_v61  ;;  %v4665_v52 = vcvt.s32.f32 %v562_v32  ;;  %6105 = vst [vmem:[#allocation17_spill] sm:$0xff] %v4695_v39  ;;  %v4697_v61 = vcvt.s32.f32 %v573_v38 }
 0x10b   : > { %v4699_v23 = vcvt.s32.f32 %v574_v43 }
 0x10c   : > { %v603_v1 = vmin.f32 %v599_v28, %v4643_v5  ;;  %6095 = vst [vmem:[#allocation7_spill] sm:$0xff] %v4665_v52  ;;  %v4675_v28 = vcvt.s32.f32 %v567_v19  ;;  %6106 = vst [vmem:[#allocation18_spill] sm:$0xff] %v4697_v61 }
 0x10d   : > { %6107 = vst [vmem:[#allocation19_spill] sm:$0xff] %v4699_v23 }
 0x10e   : > { %v606_v8 = vmin.f32 %v603_v1, %v604_v7  ;;  %6100 = vst [vmem:[#allocation12_spill] sm:$0xff] %v4675_v28  ;;  %v4725_v1 = vcvt.s32.f32 %v575_v47  ;;  %v717_v47 = vld [vmem:[%s6030_s2 + $0x10] sm:$0xff] }
 0x110   : > { %v607_v10 = vmin.f32 %v605_v4, %v606_v8  ;;  %6108 = vst [vmem:[#allocation20_spill] sm:$0xff] %v4725_v1 }
 0x112   : > { %v608_v63 = vrot.slane %v607_v10, 4 }
 0x114   : > { %v609_v11 = vmin.f32 %v607_v10, %v608_v63 }
 0x116   : > { %v610_v13 = vrot.slane %v609_v11, 2 }
 0x118   : > { %v611_v2 = vmin.f32 %v609_v11, %v610_v13 }
 0x11a   : > { %v612_v41 = vrot.slane %v611_v2, 1 }
 0x11c   : > { %v613_v40 = vmin.f32 %v611_v2, %v612_v41 }
 0x11e   : > { %vm614_vm0 = vcmp.eq.f32.partialorder %v4538_v44, %v613_v40  ;;  %vm615_vm1 = vcmp.eq.f32.partialorder %v4559_v12, %v613_v40  ;;  %vm616_vm2 = vcmp.eq.f32.partialorder %v4548_v54, %v613_v40  ;;  %vm617_vm3 = vcmp.eq.f32.partialorder %v4574_v31, %v613_v40 }
 0x11f   : > { %vm618_vm4 = vcmp.eq.f32.partialorder %v4540_v45, %v613_v40  ;;  %vm619_vm5 = vcmp.eq.f32.partialorder %v4563_v15, %v613_v40  ;;  %vm620_vm6 = vcmp.eq.f32.partialorder %v4553_v6, %v613_v40  ;;  %vm621_vm7 = vcmp.eq.f32.partialorder %v4579_v34, %v613_v40 }
 0x120   : > { %vm622_vm8 = vcmp.eq.f32.partialorder %v4571_v42, %v613_v40  ;;  %vm624_vm9 = vcmp.eq.f32.partialorder %v4616_v51, %v613_v40  ;;  %v630_v14 = vsel %vm614_vm0, %v4663_v50, 128.0  ;;  %v631_v3 = vsel %vm615_vm1, %v4665_v52, 128.0 }
 0x121   : > { %v632_v46 = vsel %vm616_vm2, %v4667_v53, 128.0  ;;  %v633_v4 = vsel %vm617_vm3, %v4669_v29, 128.0  ;;  %v634_v7 = vsel %vm618_vm4, %v4671_v55, 128.0  ;;  %v635_v44 = vsel %vm619_vm5, %v4673_v56, 128.0 }
 0x122   : > { %v636_v12 = vsel %vm620_vm6, %v4675_v28, 128.0  ;;  %v637_v54 = vsel %vm621_vm7, %v4677_v37, 128.0  ;;  %v4727_v31 = vcvt.s32.f32 %v576_v48  ;;  %vm623_vm10 = vcmp.eq.f32.partialorder %v4612_v26, %v613_v40  ;;  %v718_v48 = vld [vmem:[%s6030_s2 + $0x18] sm:$0xff] }
 0x123   : > { %vm625_vm11 = vcmp.eq.f32.partialorder %v4627_v57, %v613_v40  ;;  %vm626_vm12 = vcmp.eq.f32.partialorder %v4631_v30, %v613_v40  ;;  %vm627_vm13 = vcmp.eq.f32.partialorder %v4629_v33, %v613_v40  ;;  %vm628_vm14 = vcmp.eq.f32.partialorder %v4643_v5, %v613_v40  ;;  %v716_v5 = vld [vmem:[%s6030_s2 + $0x8] sm:$0xff] }
 0x124   : > { %6109 = vst [vmem:[#allocation21_spill] sm:$0xff] %v4727_v31  ;;  %vm629_vm15 = vcmp.eq.f32.partialorder %v4634_v58, %v613_v40  ;;  %v646_v45 = vmin.f32 %v630_v14, %v634_v7  ;;  %v647_v6 = vmin.f32 %v631_v3, %v635_v44  ;;  %v648_v15 = vmin.f32 %v632_v46, %v636_v12 }
 0x125   : > { %v649_v34 = vmin.f32 %v633_v4, %v637_v54  ;;  %v638_v8 = vsel %vm622_vm8, %v4687_v62, 128.0  ;;  %v639_v26 = vsel %vm623_vm10, %v4689_v59, 128.0  ;;  %v640_v57 = vsel %vm624_vm9, %v4693_v0, 128.0 }
 0x126   : > { %v641_v10 = vsel %vm625_vm11, %v4695_v39, 128.0  ;;  %v650_v63 = vmin.f32 %v646_v45, %v638_v8  ;;  %v651_v11 = vmin.f32 %v647_v6, %v639_v26  ;;  %v652_v13 = vmin.f32 %v648_v15, %v640_v57 }
 0x127   : > { %v653_v32 = vmin.f32 %v649_v34, %v641_v10  ;;  %v642_v49 = vsel %vm626_vm12, %v4697_v61, 128.0  ;;  %v643_v42 = vsel %vm627_vm13, %v4699_v23, 128.0  ;;  %v644_v16 = vsel %vm628_vm14, %v4725_v1, 128.0 }
 0x128   : > { %v645_v51 = vsel %vm629_vm15, %v4727_v31, 128.0  ;;  %v654_v35 = vmin.f32 %v650_v63, %v642_v49  ;;  %v655_v17 = vmin.f32 %v651_v11, %v643_v42  ;;  %v656_v2 = vmin.f32 %v652_v13, %v644_v16 }
 0x129   : > { %v657_v19 = vmin.f32 %v653_v32, %v645_v51  ;;  %v4760_v58 = vand.u32 4294901760, %v716_v5  ;;  %v6050_v40 = vmov 1.0|1.0   ;;  %v4812_v46 = vand.u32 4294901760, %v717_v47 }
 0x12a   : > { %v658_v21 = vmin.f32 %v654_v35, %v655_v17  ;;  %v4814_v4 = vand.u32 4294901760, %v718_v48  ;;  %v6033_v45 = vmov 0.0   ;;  %v6118_v51 = vmov 0 }
 0x12b   : > { %v659_v24 = vmin.f32 %v656_v2, %v657_v19  ;;  %v4803_v3 = vsub.f32 %v716_v5, %v4760_v58  ;;  %v4838_v12 = vsub.f32 %v717_v47, %v4812_v46 }
 0x12c   : > { %v4841_v54 = vsub.f32 %v718_v48, %v4814_v4 }
 0x12d   : > { %v660_v30 = vmin.f32 %v658_v21, %v659_v24  ;;  %v6035_v44 = vand.u32 4294901760, %v4803_v3 }
 0x12f   : > { %v661_v18 = vrot.slane %v660_v30, 4  ;;  %v4875_v57 = vsub.f32 %v4803_v3, %v6035_v44 }
 0x131   : > { %v662_v60 = vmin.f32 %v660_v30, %v661_v18 }
 0x133   : > { %v663_v36 = vrot.slane %v662_v60, 2 }
 0x135   : > { %v664_v33 = vmin.f32 %v662_v60, %v663_v36 }
 0x137   : > { %v665_v38 = vrot.slane %v664_v33, 1 }
 0x139   : > { %v4758_v41 = vmin.f32 %v664_v33, %v665_v38 }
 0x13b   : > { %vm667_vm0 = vcmp.eq.f32.partialorder %v4663_v50, %v4758_v41  ;;  %vm668_vm1 = vcmp.eq.f32.partialorder %v4665_v52, %v4758_v41  ;;  %vm669_vm2 = vcmp.eq.f32.partialorder %v4667_v53, %v4758_v41  ;;  %vm670_vm3 = vcmp.eq.f32.partialorder %v4669_v29, %v4758_v41 }
 0x13c   : > { %vm4776_vm4 = vmpackc.low %vm668_vm1, %vm667_vm0  ;;  %vm671_vm6 = vcmp.eq.f32.partialorder %v4671_v55, %v4758_v41  ;;  %vm672_vm7 = vcmp.eq.f32.partialorder %v4673_v56, %v4758_v41  ;;  %vm673_vm9 = vcmp.eq.f32.partialorder %v4675_v28, %v4758_v41  ;;  %vm674_vm10 = vcmp.eq.f32.partialorder %v4677_v37, %v4758_v41  ;;  %v5260_v55 = vld [vmem:[%s4479_s29] sm:$0x1] }
 0x13d   : > { %3791 = vmatprep.subr.msk.bf16.mxu0 %vm4776_vm4, %v6050_v40  ;;  %vm4798_vm5 = vmpackc.low %vm670_vm3, %vm669_vm2  ;;  %v2950_v6 = vsel %vm667_vm0, 1.0, %v6033_v45  ;;  %v2951_v15 = vsel %vm668_vm1, 1.0, %v6033_v45  ;;  %v2952_v34 = vsel %vm669_vm2, 1.0, %v6033_v45  ;;  %v2953_v8 = vsel %vm670_vm3, 1.0, %v6033_v45 }
 0x13e   : > { %3793 = vmatpush3.bf16.msk.msra.mxu0 %vm4776_vm4, %v6050_v40  ;;  %vm4825_vm8 = vmpackc.low %vm672_vm7, %vm671_vm6  ;;  %vm675_vm12 = vcmp.eq.f32.partialorder %v4687_v62, %v4758_v41  ;;  %vm676_vm13 = vcmp.eq.f32.partialorder %v4689_v59, %v4758_v41  ;;  %v4886_v11 = vsub.f32 %v2950_v6, %v2950_v6  ;;  %v4888_v13 = vsub.f32 %v2951_v15, %v2951_v15 }
 0x13f   : > { %3795 = vmatprep.subr.msk.bf16.mxu0 %vm4798_vm5, %v6050_v40  ;;  %vm4868_vm11 = vmpackc.low %vm674_vm10, %vm673_vm9  ;;  %v4890_v32 = vsub.f32 %v2952_v34, %v2952_v34  ;;  %v4892_v49 = vsub.f32 %v2953_v8, %v2953_v8  ;;  %vm677_vm14 = vcmp.eq.f32.partialorder %v4693_v0, %v4758_v41  ;;  %vm678_vm15 = vcmp.eq.f32.partialorder %v4695_v39, %v4758_v41 }
 0x140   : > { %vm679_vm0 = vcmp.eq.f32.partialorder %v4697_v61, %v4758_v41  ;;  %vm680_vm1 = vcmp.eq.f32.partialorder %v4699_v23, %v4758_v41  ;;  %v2954_v42 = vsel %vm671_vm6, 1.0, %v6033_v45  ;;  %v2955_v16 = vsel %vm672_vm7, 1.0, %v6033_v45  ;;  %vm4919_vm2 = vmpackc.low %vm676_vm13, %vm675_vm12 }
 0x141   : > { %v6119_v51 = vsel %vm4919_vm2, 4294967295, %v6118_v51  ;;  %vm681_vm3 = vcmp.eq.f32.partialorder %v4725_v1, %v4758_v41  ;;  %vm682_vm6 = vcmp.eq.f32.partialorder %v4727_v31, %v4758_v41  ;;  %v2956_v35 = vsel %vm673_vm9, 1.0, %v6033_v45  ;;  %vm4989_vm7 = vmpackc.low %vm678_vm15, %vm677_vm14 }
 0x142   : > { %3797 = vmatpush3.bf16.msk.msra.mxu0 %vm4798_vm5, %v6050_v40  ;;  %6120 = vst [vmem:[#allocation22_spill] sm:$0xff] %v6119_v51  ;;  %v2957_v17 = vsel %vm674_vm10, 1.0, %v6033_v45  ;;  %v2958_v2 = vsel %vm675_vm12, 1.0, %v6033_v45  ;;  %v2959_v19 = vsel %vm676_vm13, 1.0, %v6033_v45  ;;  %v2960_v21 = vsel %vm677_vm14, 1.0, %v6033_v45  ;;  %vm5025_vm9 = vmpackc.low %vm680_vm1, %vm679_vm0 }
 0x143   : > { %3799 = vmatprep.subr.msk.bf16.mxu0 %vm4825_vm8, %v6050_v40  ;;  %v2961_v24 = vsel %vm678_vm15, 1.0, %v6033_v45  ;;  %v2962_v30 = vsel %vm679_vm0, 1.0, %v6033_v45  ;;  %v2963_v18 = vsel %vm680_vm1, 1.0, %v6033_v45  ;;  %v2964_v60 = vsel %vm681_vm3, 1.0, %v6033_v45  ;;  %vm5055_vm10 = vmpackc.low %vm682_vm6, %vm681_vm3  ;;  %6148 = vst [vmem:[#allocation22_spill] sm:$0xff] %v5260_v55 }
 0x144   : > { %v2965_v36 = vsel %vm682_vm6, 1.0, %v6033_v45  ;;  %v843_v33 = vand.u32 4294901760, %v4886_v11  ;;  %v850_v38 = vand.u32 4294901760, %v4888_v13  ;;  %v4972_v5 = vsub.f32 %v2954_v42, %v2954_v42 }
 0x145   : > { %v4974_v47 = vsub.f32 %v2955_v16, %v2955_v16  ;;  %v4976_v48 = vsub.f32 %v2956_v35, %v2956_v35  ;;  %v4978_v6 = vsub.f32 %v2957_v17, %v2957_v17  ;;  %v6121_v15 = vmov 0 }
 0x146   : > { %3801 = vmatpush3.bf16.msk.msra.mxu0 %vm4825_vm8, %v6050_v40  ;;  %v6122_v15 = vsel %vm4989_vm7, 4294967295, %v6121_v15  ;;  %v4993_v34 = vsub.f32 %v2958_v2, %v2958_v2  ;;  %v4995_v8 = vsub.f32 %v2959_v19, %v2959_v19  ;;  %v5000_v42 = vsub.f32 %v2960_v21, %v2960_v21 }
 0x147   : > { %3803 = vmatprep.subr.msk.bf16.mxu0 %vm4868_vm11, %v6050_v40  ;;  %6123 = vst [vmem:[#allocation23_spill] sm:$0xff] %v6122_v15  ;;  %v5002_v16 = vsub.f32 %v2961_v24, %v2961_v24  ;;  %v5004_v35 = vsub.f32 %v2962_v30, %v2962_v30  ;;  %v5006_v17 = vsub.f32 %v2963_v18, %v2963_v18  ;;  %v857_v44 = vand.u32 4294901760, %v4890_v32 }
 0x148   : > { %v5008_v25 = vsub.f32 %v2964_v60, %v2964_v60  ;;  %v5010_v45 = vsub.f32 %v2965_v36, %v2965_v36  ;;  %v844_v2 = vsub.f32 %v4886_v11, %v843_v33  ;;  %v851_v19 = vsub.f32 %v4888_v13, %v850_v38 }
 0x149   : > { %v864_v27 = vand.u32 4294901760, %v4892_v49  ;;  %v6124_v21 = vmov 0  ;;  %v871_v24 = vand.u32 4294901760, %v4972_v5  ;;  %v878_v30 = vand.u32 4294901760, %v4974_v47 }
 0x14a   : > { %3805 = vmatpush3.bf16.msk.msra.mxu0 %vm4868_vm11, %v6050_v40  ;;  %v6125_v21 = vsel %vm5025_vm9, 4294967295, %v6124_v21  ;;  %v885_v18 = vand.u32 4294901760, %v4976_v48  ;;  %v892_v60 = vand.u32 4294901760, %v4978_v6  ;;  %v899_v36 = vand.u32 4294901760, %v4993_v34 }
 0x14b   : > { %3807 = vmatprep.subr.msk.bf16.mxu0 %vm4919_vm2, %v6050_v40  ;;  %6126 = vst [vmem:[#allocation24_spill] sm:$0xff] %v6125_v21  ;;  %v906_v63 = vand.u32 4294901760, %v4995_v8  ;;  %v913_v10 = vand.u32 4294901760, %v5000_v42  ;;  %v920_v23 = vand.u32 4294901760, %v5002_v16  ;;  %v927_v61 = vand.u32 4294901760, %v5004_v35 }
 0x14c   : > { %v934_v39 = vand.u32 4294901760, %v5006_v17  ;;  %v941_v0 = vand.u32 4294901760, %v5008_v25  ;;  %v845_v62 = vand.u32 4294901760, %v844_v2  ;;  %v852_v37 = vand.u32 4294901760, %v851_v19 }
 0x14d   : > { %v865_v28 = vsub.f32 %v4892_v49, %v864_v27  ;;  %v6127_v56 = vmov 1.0|1.0   ;;  %v814_v2 = vand.u32 4294901760, %v4875_v57  ;;  %v872_v19 = vsub.f32 %v4972_v5, %v871_v24 }
 0x14e   : > { %3809 = vmatpush3.bf16.msk.msra.mxu0 %vm4919_vm2, %v6050_v40  ;;  %v6130_v59 = vand.u32 4294901760, %v4838_v12  ;;  %v6131_v53 = vand.u32 4294901760, %v4841_v54  ;;  %v5070_v41 = vpack.c.bf16 %v850_v38, %v843_v33  ;;  %v5072_v31 = vpack.c.bf16 %v864_v27, %v857_v44 }
 0x14f   : > { %3811 = vmatprep.subr.msk.bf16.mxu0 %vm4989_vm7, %v6050_v40  ;;  %v5074_v1 = vpack.c.bf16 %v878_v30, %v871_v24  ;;  %v5076_v57 = vpack.c.bf16 %v892_v60, %v885_v18  ;;  %v5078_v50 = vpack.c.bf16 %v906_v63, %v899_v36  ;;  %v5080_v22 = vpack.c.bf16 %v920_v23, %v913_v10 }
 0x150   : > { %v823_v29 = vsub.f32 %v4838_v12, %v6130_v59  ;;  %v833_v52 = vsub.f32 %v4841_v54, %v6131_v53  ;;  %v5082_v59 = vpack.c.bf16 %v934_v39, %v927_v61  ;;  %v6134_v53 = vand.u32 4294901760, %v5010_v45 }
 0x151   : > { %6132 = vst [vmem:[#allocation25_spill] sm:$0xff] %v5080_v22  ;;  %v3822_v15 = vpack.c.bf16 %v852_v37, %v845_v62  ;;  %v866_v33 = vand.u32 4294901760, %v865_v28  ;;  %v879_v27 = vsub.f32 %v4974_v47, %v878_v30  ;;  %v886_v38 = vsub.f32 %v4976_v48, %v885_v18 }
 0x152   : > { %3813 = vmatpush3.bf16.msk.msra.mxu0 %vm4989_vm7, %v6050_v40  ;;  %6133 = vst [vmem:[#allocation26_spill] sm:$0xff] %v5082_v59  ;;  %v5086_v21 = vpack.c.bf16 %v6134_v53, %v941_v0  ;;  %v893_v24 = vsub.f32 %v4978_v6, %v892_v60  ;;  %v873_v22 = vand.u32 4294901760, %v872_v19 }
 0x153   : > { %3815 = vmatprep.subr.msk.bf16.mxu0 %vm5025_vm9, %v6050_v40  ;;  %v858_v40 = vsub.f32 %v4890_v32, %v857_v44  ;;  %v824_v44 = vand.u32 4294901760, %v823_v29  ;;  %v880_v53 = vand.u32 4294901760, %v879_v27  ;;  %v887_v28 = vand.u32 4294901760, %v886_v38 }
 0x154   : > { %6135 = vst [vmem:[#allocation27_spill] sm:$0xff] %v5086_v21  ;;  %v834_v21 = vand.u32 4294901760, %v833_v52  ;;  %v894_v37 = vand.u32 4294901760, %v893_v24  ;;  %v907_v29 = vsub.f32 %v4995_v8, %v906_v63  ;;  %v914_v52 = vsub.f32 %v5000_v42, %v913_v10 }
 0x155   : > { %v859_v51 = vand.u32 4294901760, %v858_v40  ;;  %v3830_v62 = vpack.c.bf16 %v880_v53, %v873_v22  ;;  %v900_v40 = vsub.f32 %v4993_v34, %v899_v36  ;;  %v928_v22 = vsub.f32 %v5004_v35, %v927_v61 }
 0x156   : > { %3817 = vmatpush3.bf16.msk.msra.mxu0 %vm5025_vm9, %v6127_v56  ;;  %v3834_v30 = vpack.c.bf16 %v894_v37, %v887_v28  ;;  %v908_v18 = vand.u32 4294901760, %v907_v29  ;;  %v915_v36 = vand.u32 4294901760, %v914_v52  ;;  %v935_v63 = vsub.f32 %v5006_v17, %v934_v39 }
 0x157   : > { %3819 = vmatprep.subr.msk.bf16.mxu0 %vm5055_vm10, %v6127_v56  ;;  %v3826_v59 = vpack.c.bf16 %v866_v33, %v859_v51  ;;  %v901_v51 = vand.u32 4294901760, %v900_v40  ;;  %v6136_v10 = vand.u32 4294901760, %v5010_v45  ;;  %v3858_v39 = vpack.c.bf16 %v4892_v49, %v4890_v32 }
 0x158   : > { %v936_v33 = vand.u32 4294901760, %v935_v63  ;;  %v3862_v24 = vpack.c.bf16 %v4974_v47, %v4972_v5  ;;  %v3874_v32 = vpack.c.bf16 %v5002_v16, %v5000_v42  ;;  %v3878_v49 = vpack.c.bf16 %v5006_v17, %v5004_v35 }
 0x159   : > { %v3838_v60 = vpack.c.bf16 %v908_v18, %v901_v51  ;;  %v3882_v5 = vpack.c.bf16 %v5010_v45, %v5008_v25 }
 0x15a   : > { %3821 = vmatpush3.bf16.msk.msra.mxu0 %vm5055_vm10, %v6127_v56 }
 0x15b   : > { %3823 = vmatprep.subr.bf16.mxu0 %v3822_v15 }
 0x15d   : > { %3349 = vmatmul.mubr.f32.vlgmr.msra.gmra.mrb[0].mxu0 %v814_v2 }
 0x15e   : > { %3825 = vmatpush3.bf16.msra.mxu0 %v3822_v15  ;;  %3351 = vmatprep.mubr.f32.mxu0 %v824_v44  ;;  %v921_v15 = vsub.f32 %v5002_v16, %v920_v23  ;;  %v949_v23 = vsub.f32 %v5010_v45, %v6136_v10 }
 0x15f   : > { %3827 = vmatprep.subr.bf16.mxu0 %v3826_v59 }
 0x160   : > { %v922_v2 = vand.u32 4294901760, %v921_v15  ;;  %v950_v44 = vand.u32 4294901760, %v949_v23 }
 0x161   : > { %3352 = vmatmul.mubr.f32.gmra.mrb[2].mxu0 %v834_v21  ;;  %v942_v21 = vsub.f32 %v5008_v25, %v941_v0  ;;  %v3854_v0 = vpack.c.bf16 %v4888_v13, %v4886_v11  ;;  %v3866_v11 = vpack.c.bf16 %v4978_v6, %v4976_v48  ;;  %v3870_v13 = vpack.c.bf16 %v4995_v8, %v4993_v34  ;;  %v5274_v8 = vld [vmem:[%s4479_s29 + $0x2] sm:$0x1] }
 0x162   : > { %3829 = vmatpush3.bf16.msra.mxu0 %v3826_v59  ;;  %3386 = vmatprep.mubr.f32.mxu0 %v4556_v9  ;;  %v3842_v19 = vpack.c.bf16 %v922_v2, %v915_v36  ;;  %v929_v59 = vand.u32 4294901760, %v928_v22  ;;  %v6137_v25 = vand.u32 4294901760, %v4567_v20  ;;  %v6141_v48 = vand.u32 4294901760, %v4803_v3 }
 0x163   : > { %3831 = vmatprep.subr.bf16.mxu0 %v3830_v62  ;;  %v943_v61 = vand.u32 4294901760, %v942_v21  ;;  %v6142_v6 = vand.u32 4294901760, %v4838_v12  ;;  %v6143_v34 = vand.u32 4294901760, %v4841_v54 }
 0x164   : > { %v3846_v27 = vpack.c.bf16 %v936_v33, %v929_v59 }
 0x165   : > { %v3850_v38 = vpack.c.bf16 %v950_v44, %v943_v61 }
 0x166   : > { %3833 = vmatpush3.bf16.msra.mxu0 %v3830_v62 }
 0x167   : > { %3835 = vmatprep.subr.bf16.mxu0 %v3834_v30 }
 0x16a   : > { %3837 = vmatpush3.bf16.msra.mxu0 %v3834_v30 }
 0x16b   : > { %3839 = vmatprep.subr.bf16.mxu0 %v3838_v60 }
 0x16e   : > { %3841 = vmatpush3.bf16.msra.mxu0 %v3838_v60 }
 0x16f   : > { %3843 = vmatprep.subr.bf16.mxu0 %v3842_v19 }
 0x172   : > { %3845 = vmatpush3.bf16.msra.mxu0 %v3842_v19 }
 0x173   : > { %3847 = vmatprep.subr.bf16.mxu0 %v3846_v27 }
 0x176   : > { %3849 = vmatpush3.bf16.msra.mxu0 %v3846_v27 }
 0x177   : > { %3851 = vmatprep.subr.bf16.mxu0 %v3850_v38 }
 0x17a   : > { %3853 = vmatpush3.bf16.msra.mxu0 %v3850_v38 }
 0x17b   : > { %3855 = vmatprep.subr.bf16.mxu0 %v3854_v0 }
 0x17d   : > { %3387 = vmatmul.mubr.f32.vlgmr.msra.gmra.mrb[0].mxu0 %v4760_v58 }
 0x17e   : > { %3857 = vmatpush3.bf16.msra.mxu0 %v3854_v0  ;;  %3389 = vmatprep.mubr.f32.mxu0 %v4812_v46 }
 0x17f   : > { %3859 = vmatprep.subr.bf16.mxu0 %v3858_v39 }
 0x181   : > { %3390 = vmatmul.mubr.f32.gmra.mrb[2].mxu0 %v4814_v4 }
 0x182   : > { %3861 = vmatpush3.bf16.msra.mxu0 %v3858_v39  ;;  %3424 = vmatprep.mubr.f32.mxu0 %v4567_v20 }
 0x183   : > { %3863 = vmatprep.subr.bf16.mxu0 %v3862_v24 }
 0x186   : > { %3865 = vmatpush3.bf16.msra.mxu0 %v3862_v24 }
 0x187   : > { %3867 = vmatprep.subr.bf16.mxu0 %v3866_v11 }
 0x18a   : > { %3869 = vmatpush3.bf16.msra.mxu0 %v3866_v11 }
 0x18b   : > { %3871 = vmatprep.subr.bf16.mxu0 %v3870_v13 }
 0x18e   : > { %3873 = vmatpush3.bf16.msra.mxu0 %v3870_v13 }
 0x18f   : > { %3875 = vmatprep.subr.bf16.mxu0 %v3874_v32 }
 0x192   : > { %3877 = vmatpush3.bf16.msra.mxu0 %v3874_v32 }
 0x193   : > { %3879 = vmatprep.subr.bf16.mxu0 %v3878_v49 }
 0x196   : > { %3881 = vmatpush3.bf16.msra.mxu0 %v3878_v49 }
 0x197   : > { %3883 = vmatprep.subr.bf16.mxu0 %v3882_v5 }
 0x19a   : > { %3885 = vmatpush3.bf16.msra.mxu0 %v3882_v5 }
 0x19b   : > { %3887 = vmatprep.subr.msk.bf16.mxu0 %vm4776_vm4, %v6127_v56 }
 0x19d   : > { %3425 = vmatmul.mubr.f32.vlgmr.msra.gmra.mrb[0].mxu0 %v4803_v3  ;;  %v6144_v3 = vld [vmem:[#allocation25_spill] sm:$0xff] }
 0x19e   : > { %3889 = vmatpush3.bf16.msk.msra.mxu0 %vm4776_vm4, %v6127_v56  ;;  %3427 = vmatprep.mubr.f32.mxu0 %v4838_v12  ;;  %v6145_v12 = vld [vmem:[#allocation26_spill] sm:$0xff] }
 0x19f   : > { %3891 = vmatprep.subr.msk.bf16.mxu0 %vm4798_vm5, %v6127_v56  ;;  %6152 = vst [vmem:[#allocation26_spill] sm:$0xff] %v5274_v8 }
 0x1a1   : > { %3428 = vmatmul.mubr.f32.gmra.mrb[2].mxu0 %v4841_v54 }
 0x1a2   : > { %3893 = vmatpush3.bf16.msk.msra.mxu0 %vm4798_vm5, %v6127_v56  ;;  %3462 = vmatprep.mubr.f32.mxu0 %v6137_v25 }
 0x1a3   : > { %3895 = vmatprep.subr.msk.bf16.mxu0 %vm4825_vm8, %v6127_v56 }
 0x1a6   : > { %3897 = vmatpush3.bf16.msk.msra.mxu0 %vm4825_vm8, %v6127_v56 }
 0x1a7   : > { %3899 = vmatprep.subr.msk.bf16.mxu0 %vm4868_vm11, %v6127_v56 }
 0x1aa   : > { %3901 = vmatpush3.bf16.msk.msra.mxu0 %vm4868_vm11, %v6127_v56 }
 0x1ab   : > { %3903 = vmatprep.subr.msk.bf16.mxu0 %vm4919_vm2, %v6127_v56 }
 0x1ae   : > { %3905 = vmatpush3.bf16.msk.msra.mxu0 %vm4919_vm2, %v6127_v56 }
 0x1af   : > { %3907 = vmatprep.subr.msk.bf16.mxu0 %vm4989_vm7, %v6127_v56 }
 0x1b2   : > { %3909 = vmatpush3.bf16.msk.msra.mxu0 %vm4989_vm7, %v6127_v56 }
 0x1b3   : > { %3911 = vmatprep.subr.msk.bf16.mxu0 %vm5025_vm9, %v6127_v56 }
 0x1b6   : > { %3913 = vmatpush3.bf16.msk.msra.mxu0 %vm5025_vm9, %v6127_v56 }
 0x1b7   : > { %3915 = vmatprep.subr.msk.bf16.mxu0 %vm5055_vm10, %v6127_v56 }
 0x1ba   : > { %3917 = vmatpush3.bf16.msk.msra.mxu0 %vm5055_vm10, %v6127_v56 }
 0x1bb   : > { %3919 = vmatprep.subr.bf16.mxu0 %v5070_v41 }
 0x1bd   : > { %3463 = vmatmul.mubr.f32.vlgmr.msra.gmra.mrb[0].mxu0 %v6141_v48 }
 0x1be   : > { %3921 = vmatpush3.bf16.msra.mxu0 %v5070_v41  ;;  %3465 = vmatprep.mubr.f32.mxu0 %v6142_v6 }
 0x1bf   : > { %3923 = vmatprep.subr.bf16.mxu0 %v5072_v31 }
 0x1c1   : > { %3466 = vmatmul.mubr.f32.gmra.mrb[2].mxu0 %v6143_v34 }
 0x1c2   : > { %3925 = vmatpush3.bf16.msra.mxu0 %v5072_v31  ;;  %3500 = vmatprep.mubr.f32.mxu0 %v4556_v9  ;;  %v6146_v31 = vld [vmem:[#allocation27_spill] sm:$0xff] }
 0x1c3   : > { %3927 = vmatprep.subr.bf16.mxu0 %v5074_v1 }
 0x1c6   : > { %3929 = vmatpush3.bf16.msra.mxu0 %v5074_v1 }
 0x1c7   : > { %3931 = vmatprep.subr.bf16.mxu0 %v5076_v57 }
 0x1ca   : > { %3933 = vmatpush3.bf16.msra.mxu0 %v5076_v57 }
 0x1cb   : > { %3935 = vmatprep.subr.bf16.mxu0 %v5078_v50 }
 0x1ce   : > { %3937 = vmatpush3.bf16.msra.mxu0 %v5078_v50  ;;  %v6147_v50 = vmov 0.0  }
 0x1cf   : > { %3939 = vmatprep.subr.bf16.mxu0 %v6144_v3 }
 0x1d2   : > { %3941 = vmatpush3.bf16.msra.mxu0 %v6144_v3 }
 0x1d3   : > { %3943 = vmatprep.subr.bf16.mxu0 %v6145_v12 }
 0x1d6   : > { %3945 = vmatpush3.bf16.msra.mxu0 %v6145_v12 }
 0x1d7   : > { %3947 = vmatprep.subr.bf16.mxu0 %v6146_v31 }
 0x1da   : > { %3949 = vmatpush3.bf16.msra.mxu0 %v6146_v31 }
 0x1db   : > { %3951 = vmatprep.subr.msk.bf16.mxu0 %vm4776_vm4, %v6127_v56 }
 0x1dd   : > { %3501 = vmatmul.mubr.f32.vlgmr.msra.gmra.mrb[0].mxu0 %v4760_v58 }
 0x1de   : > { %3953 = vmatpush3.bf16.msk.msra.mxu0 %vm4776_vm4, %v6127_v56  ;;  %3503 = vmatprep.mubr.f32.mxu0 %v4812_v46  ;;  %vm6078_vm4 = vmmov 0  }
 0x1df   : > { %3955 = vmatprep.subr.msk.bf16.mxu0 %vm4798_vm5, %v6127_v56  ;;  %3576 = vmatprep.mubr.msk.f32.mxu1 %vm6078_vm4, %v6147_v50 }
 0x1e1   : > { %3504 = vmatmul.mubr.f32.gmra.mrb[2].mxu0 %v4814_v4 }
 0x1e2   : > { %3957 = vmatpush3.bf16.msk.msra.mxu0 %vm4798_vm5, %v6127_v56  ;;  %3538 = vmatprep.mubr.f32.mxu0 %v4556_v9  ;;  %v6085_v9 = vmov 0.0|0.0  }
 0x1e3   : > { %3959 = vmatprep.subr.msk.bf16.mxu0 %vm4825_vm8, %v6127_v56  ;;  %3982 = vmatprep.subr.bf16.mxu1 %v6085_v9 }
 0x1e6   : > { %3961 = vmatpush3.bf16.msk.msra.mxu0 %vm4825_vm8, %v6127_v56 }
 0x1e7   : > { %3963 = vmatprep.subr.msk.bf16.mxu0 %vm4868_vm11, %v6127_v56 }
 0x1ea   : > { %3965 = vmatpush3.bf16.msk.msra.mxu0 %vm4868_vm11, %v6127_v56 }
 0x1eb   : > { %3967 = vmatprep.subr.msk.bf16.mxu0 %vm4919_vm2, %v6127_v56 }
 0x1ee   : > { %3969 = vmatpush3.bf16.msk.msra.mxu0 %vm4919_vm2, %v6127_v56 }
 0x1ef   : > { %3971 = vmatprep.subr.msk.bf16.mxu0 %vm4989_vm7, %v6127_v56 }
 0x1f2   : > { %3973 = vmatpush3.bf16.msk.msra.mxu0 %vm4989_vm7, %v6127_v56 }
 0x1f3   : > { %3975 = vmatprep.subr.msk.bf16.mxu0 %vm5025_vm9, %v6127_v56 }
 0x1f6   : > { %3977 = vmatpush3.bf16.msk.msra.mxu0 %vm5025_vm9, %v6127_v56 }
 0x1f7   : > { %3979 = vmatprep.subr.msk.bf16.mxu0 %vm5055_vm10, %v6127_v56 }
 0x1fa   : > { %3981 = vmatpush3.bf16.msk.msra.mxu0 %vm5055_vm10, %v6127_v56 }
 0x1fd   : > { %3539 = vmatmul.mubr.f32.vlgmr.msra.gmra.mrb[0].mxu0 %v4760_v58 }
 0x1fe   : > { %3541 = vmatprep.mubr.f32.mxu0 %v4812_v46 }
 0x201   : > { %3542 = vmatmul.mubr.f32.gmra.mrb[2].mxu0 %v4814_v4  ;;  %v5268_v4 = vld [vmem:[%s4479_s29 + $0x1] sm:$0x1]  ;;  %s3079_s29 = sshll.u32 %s4397_s19, 6  ;;  %s2872_s19 = scalar_lea.sflag [#allocation3], %s186_s27 }
 0x202   : > { %6150 = vst [vmem:[#allocation24_spill] sm:$0xff] %v5268_v4  ;;  %s5984_s8 = scalar_lea.hbm %s6032_s4, %s3079_s29 }
 0x2d0   : > { %v3540_v1 = vpop.f32.mrb[0].mxu0 }
 0x2d1   : > { %v1467_v43 = vpop.f32.mrb[1].mxu0  ;;  %v1529_v51 = vrot.slane %v3540_v1, 1  ;;  %v1532_v18 = vrot.slane %v3540_v1, 2  ;;  %v1536_v52 = vrot.slane %v3540_v1, 3  ;;  %v1548_v15 = vrot.slane %v3540_v1, 4 }
 0x2d2   : > { %v1514_v30 = vadd.f32 0.5, %v1467_v43  ;;  %v1551_v22 = vrot.slane %v3540_v1, 5  ;;  %v1555_v60 = vrot.slane %v3540_v1, 6  ;;  %v1566_v36 = vrot.slane %v3540_v1, 7 }
 0x2d3   : > { %v1517_v2 = vrot.slane %v1467_v43, 6  ;;  %v1520_v19 = vrot.slane %v1467_v43, 7 }
 0x2d4   : > { %v3543_v14 = vpop.f32.mrb[2].mxu0  ;;  %v5285_v21 = vfloor.f32 %v1514_v30 }
 0x2d5   : > { %v5263_v7 = vsub.f32 %v5260_v55, %v3543_v14  ;;  %v1491_v58 = vrot.slane %v3543_v14, 1  ;;  %v1494_v46 = vrot.slane %v3543_v14, 2  ;;  %v5265_v54 = vpop.f32.mrb[3].mxu0 }
 0x2d6   : > { %v1572_v59 = vrot.slane %v5265_v54, 1  ;;  %v1583_v33 = vrot.slane %v5265_v54, 2  ;;  %v1586_v61 = vrot.slane %v5265_v54, 3  ;;  %v1590_v44 = vrot.slane %v5265_v54, 4 }
 0x2d7   : > { %6149 = vst [vmem:[#allocation23_spill] sm:$0xff] %v5263_v7  ;;  %v5271_v26 = vsub.f32 %v5268_v4, %v1491_v58  ;;  %v5277_v42 = vsub.f32 %v5274_v8, %v1494_v46  ;;  %v1497_v16 = vmul.f32 %v5263_v7, %v5263_v7  ;;  %v1601_v38 = vrot.slane %v5265_v54, 5 }
 0x2d8   : > { %v1604_v0 = vrot.slane %v5265_v54, 6  ;;  %v1608_v39 = vrot.slane %v5265_v54, 7 }
 0x2d9   : > { %6151 = vst [vmem:[#allocation25_spill] sm:$0xff] %v5271_v26  ;;  %6153 = vst [vmem:[#allocation27_spill] sm:$0xff] %v5277_v42  ;;  %v1498_v35 = vmul.f32 %v5271_v26, %v5271_v26  ;;  %v1500_v41 = vmul.f32 %v5277_v42, %v5277_v42 }
 0x2db   : > { %v1499_v17 = vadd.f32 %v1498_v35, %v1497_v16 }
 0x2dd   : > { %v1501_v57 = vadd.f32 %v1500_v41, %v1499_v17 }
 0x2df   : > { %4233 = vrsqrt.f32 %v1501_v57  ;;  %vm1504_vm5 = vcmp.eq.f32.partialorder %v1501_v57, inf  ;;  %v1507_v37 = vand.u32 2147483648, %v1501_v57  ;;  %vm1506_vm8 = vcmp.eq.f32.partialorder %v1501_v57, 0.0 }
 0x2e9   : > { %v4234_v53 = vpop.eup %4233 }
 0x2ea   : > { %v1503_v28 = vmul.f32 %v4234_v53, %v1501_v57 }
 0x2ec   : > { %v1505_v62 = vsel %vm1504_vm5, %v1501_v57, %v1503_v28 }
 0x2ed   : > { %v1508_v40 = vsel %vm1506_vm8, %v1507_v37, %v1505_v62 }
 0x2ee   : > { %v1509_v29 = vmax.f32 %v1508_v40, 1e-08 }
 0x2f0   : > { %4235 = vrcp.f32 %v1509_v29 }
 0x2fa   : > { %v4236_v63 = vpop.eup %4235 }
 0x2fb   : > { %v1511_v10 = vmul.f32 %v4236_v63, %v5263_v7  ;;  %v1512_v23 = vmul.f32 %v4236_v63, %v5271_v26  ;;  %v1513_v27 = vmul.f32 %v4236_v63, %v5277_v42 }
 0x2fd   : > { %v1519_v24 = vmul.f32 %v1517_v2, %v1511_v10  ;;  %v1522_v11 = vmul.f32 %v1520_v19, %v1512_v23  ;;  %v1524_v13 = vmul.f32 %v3540_v1, %v1513_v27  ;;  %v1531_v32 = vmul.f32 %v1529_v51, %v1511_v10 }
 0x2fe   : > { %v1534_v49 = vmul.f32 %v1532_v18, %v1512_v23  ;;  %v1538_v5 = vmul.f32 %v1536_v52, %v1513_v27  ;;  %v1550_v25 = vmul.f32 %v1548_v15, %v1511_v10  ;;  %v1553_v45 = vmul.f32 %v1551_v22, %v1512_v23 }
 0x2ff   : > { %v1523_v20 = vadd.f32 %v1522_v11, %v1519_v24  ;;  %v1557_v47 = vmul.f32 %v1555_v60, %v1513_v27  ;;  %v1568_v48 = vmul.f32 %v1566_v36, %v1511_v10  ;;  %v1569_v6 = vmul.f32 %v1512_v23, %v5265_v54 }
 0x300   : > { %v1535_v34 = vadd.f32 %v1534_v49, %v1531_v32  ;;  %v1554_v3 = vadd.f32 %v1553_v45, %v1550_v25  ;;  %v1574_v12 = vmul.f32 %v1572_v59, %v1513_v27  ;;  %v1585_v31 = vmul.f32 %v1583_v33, %v1511_v10  ;;  %v6154_v32 = vld [vmem:[#allocation5_spill] sm:$0xff]  ;;  %v6156_v25 = vld [vmem:[#allocation6_spill] sm:$0xff]  ;;  %v6157_v45 = vld [vmem:[#allocation7_spill] sm:$0xff] }
 0x301   : > { %v1525_v43 = vadd.f32 %v1524_v13, %v1523_v20  ;;  %v1570_v14 = vadd.f32 %v1569_v6, %v1568_v48  ;;  %v1588_v58 = vmul.f32 %v1586_v61, %v1512_v23  ;;  %v1592_v46 = vmul.f32 %v1590_v44, %v1513_v27  ;;  %v1670_v13 = vld [vmem:[%s6031_s3] sm:$0xff]  ;;  %v6161_v6 = vld [vmem:[#allocation9_spill] sm:$0xff] }
 0x302   : > { %v1539_v16 = vadd.f32 %v1538_v5, %v1535_v34  ;;  %v1558_v1 = vadd.f32 %v1557_v47, %v1554_v3  ;;  %v1603_v35 = vmul.f32 %v1601_v38, %v1511_v10  ;;  %v1606_v17 = vmul.f32 %v1604_v0, %v1512_v23  ;;  %v1671_v47 = vld [vmem:[%s6031_s3 + $0x8] sm:$0xff]  ;;  %v6160_v48 = vld [vmem:[#allocation8_spill] sm:$0xff] }
 0x303   : > { %v1526_v41 = vand.u32 2147483647, %v1525_v43  ;;  %v1575_v57 = vadd.f32 %v1574_v12, %v1570_v14  ;;  %v1589_v53 = vadd.f32 %v1588_v58, %v1585_v31  ;;  %v1610_v28 = vmul.f32 %v1608_v39, %v1513_v27  ;;  %v1672_v31 = vld [vmem:[%s6031_s3 + $0x10] sm:$0xff] }
 0x304   : > { %v1540_v37 = vand.u32 2147483647, %v1539_v16  ;;  %v1559_v62 = vand.u32 2147483647, %v1558_v1  ;;  %v1607_v40 = vadd.f32 %v1606_v17, %v1603_v35  ;;  %v1545_v52 = vrot.slane %v5285_v21, 1  ;;  %v6164_v58 = vld [vmem:[#allocation10_spill] sm:$0xff] }
 0x305   : > { %v1527_v54 = vsub.f32 1.0, %v1526_v41  ;;  %v1593_v29 = vadd.f32 %v1592_v46, %v1589_v53  ;;  %v1576_v51 = vand.u32 2147483647, %v1575_v57  ;;  %v1563_v60 = vrot.slane %v5285_v21, 2  ;;  %v6165_v46 = vld [vmem:[#allocation11_spill] sm:$0xff] }
 0x306   : > { %v1541_v30 = vsub.f32 1.0, %v1540_v37  ;;  %v1611_v18 = vadd.f32 %v1610_v28, %v1607_v40  ;;  %v1560_v15 = vsub.f32 1.0, %v1559_v62  ;;  %v1580_v59 = vrot.slane %v5285_v21, 3  ;;  %v6168_v37 = vld [vmem:[#allocation12_spill] sm:$0xff]  ;;  %v6169_v62 = vld [vmem:[#allocation13_spill] sm:$0xff] }
 0x307   : > { %v1594_v22 = vand.u32 2147483647, %v1593_v29  ;;  %v1577_v63 = vsub.f32 1.0, %v1576_v51  ;;  %v1598_v27 = vrot.slane %v5285_v21, 4  ;;  %v1615_v0 = vrot.slane %v5285_v21, 5 }
 0x308   : > { %vm1542_vm11 = vcmp.lt.f32.partialorder %v1541_v30, %v1527_v54  ;;  %v1612_v19 = vand.u32 2147483647, %v1611_v18  ;;  %v6155_v49 = vsub.s32 0, %v6154_v32  ;;  %v5315_v20 = vand.u32 4294901760, %v1670_v13 }
 0x309   : > { %v1543_v36 = vsel %vm1542_vm11, %v1541_v30, %v1527_v54  ;;  %v1547_v2 = vsel %vm1542_vm11, %v1545_v52, %v5285_v21  ;;  %v1595_v23 = vsub.f32 1.0, %v1594_v22  ;;  %v5335_v3 = vand.u32 4294901760, %v1671_v47  ;;  %v6172_v22 = vld [vmem:[#allocation14_spill] sm:$0xff] }
 0x30a   : > { %vm1561_vm12 = vcmp.lt.f32.partialorder %v1560_v15, %v1543_v36  ;;  %v1613_v38 = vsub.f32 1.0, %v1612_v19  ;;  %v5333_v34 = vsub.f32 %v1670_v13, %v5315_v20  ;;  %v5364_v35 = vand.u32 4294901760, %v1672_v31  ;;  %v6177_v19 = vld [vmem:[#allocation19_spill] sm:$0xff] }
 0x30b   : > { %v1562_v33 = vsel %vm1561_vm12, %v1560_v15, %v1543_v36  ;;  %v1565_v10 = vsel %vm1561_vm12, %v1563_v60, %v1547_v2  ;;  %v5362_v1 = vsub.f32 %v1671_v47, %v5335_v3  ;;  %v6173_v60 = vld [vmem:[#allocation15_spill] sm:$0xff]  ;;  %v6174_v36 = vld [vmem:[#allocation16_spill] sm:$0xff]  ;;  %v6175_v2 = vld [vmem:[#allocation17_spill] sm:$0xff] }
 0x30c   : > { %vm1578_vm13 = vcmp.lt.f32.partialorder %v1577_v63, %v1562_v33  ;;  %v6080_v16 = vand.u32 4294901760, %v5333_v34  ;;  %v5403_v29 = vsub.f32 %v1672_v31, %v5364_v35 }
 0x30d   : > { %v1579_v61 = vsel %vm1578_vm13, %v1577_v63, %v1562_v33  ;;  %v1582_v44 = vsel %vm1578_vm13, %v1580_v59, %v1565_v10  ;;  %v6084_v54 = vand.u32 4294901760, %v5362_v1  ;;  %v6176_v63 = vld [vmem:[#allocation18_spill] sm:$0xff]  ;;  %v6178_v59 = vld [vmem:[#allocation20_spill] sm:$0xff]  ;;  %v6179_v33 = vld [vmem:[#allocation21_spill] sm:$0xff] }
 0x30e   : > { %vm1596_vm14 = vcmp.lt.f32.partialorder %v1595_v23, %v1579_v61  ;;  %v5399_v40 = vsub.f32 %v5333_v34, %v6080_v16  ;;  %v6194_v26 = vand.u32 4294901760, %v5403_v29 }
 0x30f   : > { %v1597_v39 = vsel %vm1596_vm14, %v1595_v23, %v1579_v61  ;;  %v1600_v24 = vsel %vm1596_vm14, %v1598_v27, %v1582_v44 }
 0x310   : > { %vm1614_vm15 = vcmp.lt.f32.partialorder %v1613_v38, %v1597_v39 }
 0x311   : > { %v1617_v11 = vsel %vm1614_vm15, %v1615_v0, %v1600_v24 }
 0x312   : > { %v5309_v5 = vrot.slane %v1617_v11, %v6155_v49 }
 0x314   : > { %vm1622_vm0 = vcmp.eq.f32.partialorder %v6156_v25, %v5309_v5  ;;  %vm1623_vm1 = vcmp.eq.f32.partialorder %v6157_v45, %v5309_v5  ;;  %vm1624_vm3 = vcmp.eq.f32.partialorder %v6160_v48, %v5309_v5  ;;  %vm1625_vm6 = vcmp.eq.f32.partialorder %v6161_v6, %v5309_v5 }
 0x315   : > { %vm5317_vm2 = vmpackc.low %vm1623_vm1, %vm1622_vm0  ;;  %v3014_v43 = vsel %vm1622_vm0, 1.0, %v6147_v50  ;;  %v3015_v14 = vsel %vm1623_vm1, 1.0, %v6147_v50  ;;  %vm1626_vm9 = vcmp.eq.f32.partialorder %v6164_v58, %v5309_v5  ;;  %vm1627_vm10 = vcmp.eq.f32.partialorder %v6165_v46, %v5309_v5 }
 0x316   : > { %3984 = vmatpush3.bf16.msk.msra.mxu1 %vm5317_vm2, %v6127_v56  ;;  %vm5343_vm7 = vmpackc.low %vm1625_vm6, %vm1624_vm3  ;;  %v5366_v17 = vsub.f32 %v3014_v43, %v3014_v43  ;;  %v5368_v41 = vsub.f32 %v3015_v14, %v3015_v14  ;;  %v3016_v53 = vsel %vm1624_vm3, 1.0, %v6147_v50  ;;  %v3017_v28 = vsel %vm1625_vm6, 1.0, %v6147_v50 }
 0x317   : > { %3985 = vmatprep.subr.bf16.mxu1 %v6085_v9  ;;  %vm5376_vm5 = vmpackc.low %vm1627_vm10, %vm1626_vm9  ;;  %vm1628_vm8 = vcmp.eq.f32.partialorder %v6168_v37, %v5309_v5  ;;  %vm1629_vm11 = vcmp.eq.f32.partialorder %v6169_v62, %v5309_v5  ;;  %v5407_v18 = vsub.f32 %v3016_v53, %v3016_v53  ;;  %v5409_v52 = vsub.f32 %v3017_v28, %v3017_v28 }
 0x318   : > { %v1787_v30 = vand.u32 4294901760, %v5366_v17  ;;  %v6081_v51 = vand.u32 4294901760, %v5368_v41  ;;  %vm5417_vm12 = vmpackc.low %vm1629_vm11, %vm1628_vm8  ;;  %vm1630_vm13 = vcmp.eq.f32.partialorder %v6172_v22, %v5309_v5  ;;  %vm1631_vm14 = vcmp.eq.f32.partialorder %v6173_v60, %v5309_v5 }
 0x319   : > { %vm1632_vm15 = vcmp.eq.f32.partialorder %v6174_v36, %v5309_v5  ;;  %vm1633_vm0 = vcmp.eq.f32.partialorder %v6175_v2, %v5309_v5  ;;  %vm1634_vm1 = vcmp.eq.f32.partialorder %v6176_v63, %v5309_v5  ;;  %vm1635_vm3 = vcmp.eq.f32.partialorder %v6177_v19, %v5309_v5 }
 0x31a   : > { %3987 = vmatpush3.bf16.msk.msra.mxu1 %vm5343_vm7, %v6127_v56  ;;  %vm1636_vm6 = vcmp.eq.f32.partialorder %v6178_v59, %v5309_v5  ;;  %vm1637_vm4 = vcmp.eq.f32.partialorder %v6179_v33, %v5309_v5  ;;  %v3018_v10 = vsel %vm1626_vm9, 1.0, %v6147_v50  ;;  %v3019_v23 = vsel %vm1627_vm10, 1.0, %v6147_v50  ;;  %vm5465_vm9 = vmpackc.low %vm1631_vm14, %vm1630_vm13 }
 0x31b   : > { %3988 = vmatprep.subr.bf16.mxu1 %v6085_v9  ;;  %v3020_v27 = vsel %vm1628_vm8, 1.0, %v6147_v50  ;;  %v3021_v61 = vsel %vm1629_vm11, 1.0, %v6147_v50  ;;  %v3022_v44 = vsel %vm1630_vm13, 1.0, %v6147_v50  ;;  %v3023_v38 = vsel %vm1631_vm14, 1.0, %v6147_v50  ;;  %vm5519_vm10 = vmpackc.low %vm1633_vm0, %vm1632_vm15 }
 0x31c   : > { %v3024_v39 = vsel %vm1632_vm15, 1.0, %v6147_v50  ;;  %v3025_v24 = vsel %vm1633_vm0, 1.0, %v6147_v50  ;;  %v3026_v11 = vsel %vm1634_vm1, 1.0, %v6147_v50  ;;  %v3027_v13 = vsel %vm1635_vm3, 1.0, %v6147_v50  ;;  %vm5557_vm8 = vmpackc.low %vm1635_vm3, %vm1634_vm1 }
 0x31d   : > { %v3028_v32 = vsel %vm1636_vm6, 1.0, %v6147_v50  ;;  %v3029_v49 = vsel %vm1637_vm4, 1.0, %v6147_v50  ;;  %v5496_v25 = vsub.f32 %v3018_v10, %v3018_v10  ;;  %v5498_v45 = vsub.f32 %v3019_v23, %v3019_v23  ;;  %vm5594_vm11 = vmpackc.low %vm1637_vm4, %vm1636_vm6 }
 0x31e   : > { %3990 = vmatpush3.bf16.msk.msra.mxu1 %vm5376_vm5, %v6127_v56  ;;  %v5500_v47 = vsub.f32 %v3020_v27, %v3020_v27  ;;  %v5502_v48 = vsub.f32 %v3021_v61, %v3021_v61  ;;  %v5505_v6 = vsub.f32 %v3022_v44, %v3022_v44  ;;  %v5507_v31 = vsub.f32 %v3023_v38, %v3023_v38 }
 0x31f   : > { %3991 = vmatprep.subr.bf16.mxu1 %v6085_v9  ;;  %v5509_v43 = vsub.f32 %v3024_v39, %v3024_v39  ;;  %v5511_v14 = vsub.f32 %v3025_v24, %v3025_v24  ;;  %v5523_v46 = vsub.f32 %v3026_v11, %v3026_v11  ;;  %v5525_v53 = vsub.f32 %v3027_v13, %v3027_v13 }
 0x320   : > { %v5527_v28 = vsub.f32 %v3028_v32, %v3028_v32  ;;  %v5529_v37 = vsub.f32 %v3029_v49, %v3029_v49  ;;  %v1788_v62 = vsub.f32 %v5366_v17, %v1787_v30  ;;  %v1795_v22 = vsub.f32 %v5368_v41, %v6081_v51 }
 0x321   : > { %v1801_v60 = vand.u32 4294901760, %v5407_v18  ;;  %v1808_v36 = vand.u32 4294901760, %v5409_v52  ;;  %v1815_v2 = vand.u32 4294901760, %v5496_v25  ;;  %v1822_v10 = vand.u32 4294901760, %v5498_v45 }
 0x322   : > { %3993 = vmatpush3.bf16.msk.msra.mxu1 %vm5417_vm12, %v6127_v56  ;;  %v1829_v23 = vand.u32 4294901760, %v5500_v47  ;;  %v1836_v27 = vand.u32 4294901760, %v5502_v48  ;;  %v1843_v61 = vand.u32 4294901760, %v5505_v6  ;;  %v1850_v44 = vand.u32 4294901760, %v5507_v31 }
 0x323   : > { %3994 = vmatprep.subr.bf16.mxu1 %v6085_v9  ;;  %v1857_v38 = vand.u32 4294901760, %v5509_v43  ;;  %v1864_v39 = vand.u32 4294901760, %v5511_v14  ;;  %v1758_v63 = vand.u32 4294901760, %v5399_v40  ;;  %v1767_v19 = vsub.f32 %v5362_v1, %v6084_v54 }
 0x324   : > { %v1789_v51 = vand.u32 4294901760, %v1788_v62  ;;  %v1796_v11 = vand.u32 4294901760, %v1795_v22  ;;  %v1802_v32 = vsub.f32 %v5407_v18, %v1801_v60  ;;  %v1809_v49 = vsub.f32 %v5409_v52, %v1808_v36 }
 0x325   : > { %v6186_v13 = vand.u32 4294901760, %v5368_v41  ;;  %v5582_v40 = vpack.c.bf16 %v1808_v36, %v1801_v60  ;;  %v5584_v4 = vpack.c.bf16 %v1822_v10, %v1815_v2  ;;  %v5586_v54 = vpack.c.bf16 %v1836_v27, %v1829_v23 }
 0x326   : > { %3996 = vmatpush3.bf16.msk.msra.mxu1 %vm5465_vm9, %v6127_v56  ;;  %v5598_v22 = vpack.c.bf16 %v1850_v44, %v1843_v61  ;;  %v6189_v60 = vand.u32 4294901760, %v5523_v46  ;;  %v6190_v36 = vand.u32 4294901760, %v5525_v53  ;;  %v6191_v16 = vand.u32 4294901760, %v5527_v28 }
 0x327   : > { %3997 = vmatprep.subr.bf16.mxu1 %v6085_v9  ;;  %v5580_v8 = vpack.c.bf16 %v6186_v13, %v1787_v30  ;;  %v5600_v30 = vpack.c.bf16 %v1864_v39, %v1857_v38  ;;  %v6192_v59 = vand.u32 4294901760, %v5529_v37  ;;  %v6193_v5 = vmov 0.0|0.0  }
 0x328   : > { %v5606_v13 = vpack.c.bf16 %v6190_v36, %v6189_v60  ;;  %v4007_v33 = vpack.c.bf16 %v1796_v11, %v1789_v51  ;;  %v1803_v55 = vand.u32 4294901760, %v1802_v32  ;;  %v1810_v7 = vand.u32 4294901760, %v1809_v49 }
 0x329   : > { %v1816_v42 = vsub.f32 %v5496_v25, %v1815_v2  ;;  %v1823_v60 = vsub.f32 %v5498_v45, %v1822_v10  ;;  %v1768_v36 = vand.u32 4294901760, %v1767_v19  ;;  %vm6195_vm4 = vmmov 0  }
 0x32a   : > { %3999 = vmatpush3.bf16.msk.msra.mxu1 %vm5519_vm10, %v6127_v56  ;;  %v1830_v51 = vsub.f32 %v5500_v47, %v1829_v23  ;;  %v4010_v11 = vpack.c.bf16 %v1810_v7, %v1803_v55  ;;  %v1837_v2 = vsub.f32 %v5502_v48, %v1836_v27  ;;  %v1851_v23 = vsub.f32 %v5507_v31, %v1850_v44 }
 0x32b   : > { %4000 = vmatprep.subr.bf16.mxu1 %v6085_v9  ;;  %v1817_v32 = vand.u32 4294901760, %v1816_v42  ;;  %v1824_v49 = vand.u32 4294901760, %v1823_v60  ;;  %v1858_v55 = vsub.f32 %v5509_v43, %v1857_v38  ;;  %v6198_v38 = vand.u32 4294901760, %v5527_v28 }
 0x32c   : > { %v1831_v19 = vand.u32 4294901760, %v1830_v51  ;;  %v1852_v27 = vand.u32 4294901760, %v1851_v23  ;;  %v6197_v51 = vand.u32 4294901760, %v5525_v53 }
 0x32e   : > { %4002 = vmatpush3.bf16.msk.msra.mxu1 %vm5557_vm8, %v6127_v56 }
 0x32f   : > { %4003 = vmatprep.subr.bf16.mxu1 %v6085_v9  ;;  %v5612_v9 = vpack.c.bf16 %v6192_v59, %v6191_v16  ;;  %v1777_v16 = vsub.f32 %v5403_v29, %v6194_v26  ;;  %v1844_v26 = vsub.f32 %v5505_v6, %v1843_v61  ;;  %v1838_v59 = vand.u32 4294901760, %v1837_v2 }
 0x330   : > { %v1859_v61 = vand.u32 4294901760, %v1858_v55  ;;  %v4031_v55 = vpack.c.bf16 %v5368_v41, %v5366_v17  ;;  %v4037_v17 = vpack.c.bf16 %v5498_v45, %v5496_v25  ;;  %v4040_v41 = vpack.c.bf16 %v5502_v48, %v5500_v47 }
 0x331   : > { %v1778_v10 = vand.u32 4294901760, %v1777_v16  ;;  %v4016_v7 = vpack.c.bf16 %v1838_v59, %v1831_v19  ;;  %v1845_v42 = vand.u32 4294901760, %v1844_v26  ;;  %v4049_v25 = vpack.c.bf16 %v5525_v53, %v5523_v46 }
 0x332   : > { %4005 = vmatpush3.bf16.msk.msra.mxu1 %vm5594_vm11, %v6127_v56  ;;  %v4052_v45 = vpack.c.bf16 %v5529_v37, %v5527_v28  ;;  %v6200_v47 = vand.u32 4294901760, %v5333_v34  ;;  %v6201_v48 = vand.u32 4294901760, %v5362_v1 }
 0x333   : > { %4006 = vmatprep.subr.bf16.mxu1 %v6193_v5  ;;  %v4019_v60 = vpack.c.bf16 %v1852_v27, %v1845_v42 }
 0x335   : > { %3577 = vmatmul.mubr.f32.vlgmr.msra.gmra.mrb[0].mxu1 %v1758_v63  ;;  %v4013_v63 = vpack.c.bf16 %v1824_v49, %v1817_v32 }
 0x336   : > { %4008 = vmatpush3.bf16.msra.mxu1 %v4007_v33  ;;  %3579 = vmatprep.mubr.msk.f32.mxu1 %vm6195_vm4, %v6147_v50  ;;  %v1865_v33 = vsub.f32 %v5511_v14, %v1864_v39  ;;  %v1886_v39 = vsub.f32 %v5527_v28, %v6198_v38 }
 0x337   : > { %4009 = vmatprep.subr.bf16.mxu1 %v6193_v5 }
 0x338   : > { %v1866_v44 = vand.u32 4294901760, %v1865_v33  ;;  %v1887_v19 = vand.u32 4294901760, %v1886_v39 }
 0x339   : > { %3580 = vmatmul.mubr.f32.gmra.mrb[2].mxu1 %v1768_v36  ;;  %v6196_v36 = vand.u32 4294901760, %v5523_v46 }
 0x33a   : > { %4011 = vmatpush3.bf16.msra.mxu1 %v4010_v11  ;;  %3582 = vmatprep.mubr.msk.f32.mxu1 %vm6195_vm4, %v6147_v50  ;;  %v1879_v11 = vsub.f32 %v5525_v53, %v6197_v51  ;;  %v4022_v32 = vpack.c.bf16 %v1866_v44, %v1859_v61 }
 0x33b   : > { %4012 = vmatprep.subr.bf16.mxu1 %v6193_v5  ;;  %v1872_v16 = vsub.f32 %v5523_v46, %v6196_v36  ;;  %v6208_v36 = vld [vmem:[#allocation26_spill] sm:$0xff] }
 0x33c   : > { %v1880_v2 = vand.u32 4294901760, %v1879_v11 }
 0x33d   : > { %3583 = vmatmul.mubr.f32.gmra.mrb[4].mxu1 %v1778_v10  ;;  %v1873_v49 = vand.u32 4294901760, %v1872_v16  ;;  %v6199_v10 = vand.u32 4294901760, %v5529_v37 }
 0x33e   : > { %4014 = vmatpush3.bf16.msra.mxu1 %v4013_v63  ;;  %3617 = vmatprep.mubr.msk.f32.mxu1 %vm6195_vm4, %v6147_v50 }
 0x33f   : > { %4015 = vmatprep.subr.bf16.mxu1 %v6193_v5  ;;  %v1893_v26 = vsub.f32 %v5529_v37, %v6199_v10  ;;  %v4025_v63 = vpack.c.bf16 %v1880_v2, %v1873_v49  ;;  %v6206_v37 = vld [vmem:[#allocation22_spill] sm:$0xff] }
 0x341   : > { %v1894_v59 = vand.u32 4294901760, %v1893_v26 }
 0x342   : > { %4017 = vmatpush3.bf16.msra.mxu1 %v4016_v7  ;;  %v4034_v7 = vpack.c.bf16 %v5409_v52, %v5407_v18  ;;  %v4043_v18 = vpack.c.bf16 %v5507_v31, %v5505_v6  ;;  %v4046_v52 = vpack.c.bf16 %v5511_v14, %v5509_v43 }
 0x343   : > { %4018 = vmatprep.subr.bf16.mxu1 %v6193_v5  ;;  %v4028_v23 = vpack.c.bf16 %v1894_v59, %v1887_v19 }
 0x346   : > { %4020 = vmatpush3.bf16.msra.mxu1 %v4019_v60  ;;  %v6207_v60 = vld [vmem:[#allocation24_spill] sm:$0xff] }
 0x347   : > { %4021 = vmatprep.subr.bf16.mxu1 %v6193_v5 }
 0x34a   : > { %4023 = vmatpush3.bf16.msra.mxu1 %v4022_v32 }
 0x34b   : > { %4024 = vmatprep.subr.bf16.mxu1 %v6193_v5 }
 0x34e   : > { %4026 = vmatpush3.bf16.msra.mxu1 %v4025_v63 }
 0x34f   : > { %4027 = vmatprep.subr.bf16.mxu1 %v6193_v5 }
 0x352   : > { %4029 = vmatpush3.bf16.msra.mxu1 %v4028_v23 }
 0x353   : > { %4030 = vmatprep.subr.bf16.mxu1 %v6193_v5 }
 0x355   : > { %3618 = vmatmul.mubr.f32.vlgmr.msra.gmra.mrb[0].mxu1 %v5315_v20 }
 0x356   : > { %4032 = vmatpush3.bf16.msra.mxu1 %v4031_v55  ;;  %3620 = vmatprep.mubr.msk.f32.mxu1 %vm6195_vm4, %v6147_v50 }
 0x357   : > { %4033 = vmatprep.subr.bf16.mxu1 %v6193_v5 }
 0x359   : > { %3621 = vmatmul.mubr.f32.gmra.mrb[2].mxu1 %v5335_v3 }
 0x35a   : > { %4035 = vmatpush3.bf16.msra.mxu1 %v4034_v7  ;;  %3623 = vmatprep.mubr.msk.f32.mxu1 %vm6195_vm4, %v6147_v50 }
 0x35b   : > { %4036 = vmatprep.subr.bf16.mxu1 %v6193_v5 }
 0x35d   : > { %3624 = vmatmul.mubr.f32.gmra.mrb[4].mxu1 %v5364_v35 }
 0x35e   : > { %4038 = vmatpush3.bf16.msra.mxu1 %v4037_v17  ;;  %3658 = vmatprep.mubr.msk.f32.mxu1 %vm6195_vm4, %v6147_v50 }
 0x35f   : > { %4039 = vmatprep.subr.bf16.mxu1 %v6193_v5 }
 0x362   : > { %4041 = vmatpush3.bf16.msra.mxu1 %v4040_v41 }
 0x363   : > { %4042 = vmatprep.subr.bf16.mxu1 %v6193_v5 }
 0x366   : > { %4044 = vmatpush3.bf16.msra.mxu1 %v4043_v18 }
 0x367   : > { %4045 = vmatprep.subr.bf16.mxu1 %v6193_v5 }
 0x36a   : > { %4047 = vmatpush3.bf16.msra.mxu1 %v4046_v52 }
 0x36b   : > { %4048 = vmatprep.subr.bf16.mxu1 %v6193_v5 }
 0x36e   : > { %4050 = vmatpush3.bf16.msra.mxu1 %v4049_v25 }
 0x36f   : > { %4051 = vmatprep.subr.bf16.mxu1 %v6193_v5 }
 0x372   : > { %4053 = vmatpush3.bf16.msra.mxu1 %v4052_v45 }
 0x373   : > { %4054 = vmatprep.subr.bf16.mxu1 %v6193_v5 }
 0x375   : > { %3659 = vmatmul.mubr.f32.vlgmr.msra.gmra.mrb[0].mxu1 %v5333_v34  ;;  %v6202_v34 = vand.u32 4294901760, %v5403_v29 }
 0x376   : > { %4056 = vmatpush3.bf16.msk.msra.mxu1 %vm5317_vm2, %v6127_v56  ;;  %3661 = vmatprep.mubr.msk.f32.mxu1 %vm6195_vm4, %v6147_v50 }
 0x377   : > { %4057 = vmatprep.subr.bf16.mxu1 %v6193_v5 }
 0x379   : > { %3662 = vmatmul.mubr.f32.gmra.mrb[2].mxu1 %v5362_v1 }
 0x37a   : > { %4059 = vmatpush3.bf16.msk.msra.mxu1 %vm5343_vm7, %v6127_v56  ;;  %3664 = vmatprep.mubr.msk.f32.mxu1 %vm6195_vm4, %v6147_v50 }
 0x37b   : > { %4060 = vmatprep.subr.bf16.mxu1 %v6193_v5 }
 0x37d   : > { %3665 = vmatmul.mubr.f32.gmra.mrb[4].mxu1 %v5403_v29 }
 0x37e   : > { %4062 = vmatpush3.bf16.msk.msra.mxu1 %vm5376_vm5, %v6127_v56  ;;  %3699 = vmatprep.mubr.msk.f32.mxu1 %vm6195_vm4, %v6147_v50 }
 0x37f   : > { %4063 = vmatprep.subr.bf16.mxu1 %v6193_v5 }
 0x382   : > { %4065 = vmatpush3.bf16.msk.msra.mxu1 %vm5417_vm12, %v6127_v56 }
 0x383   : > { %4066 = vmatprep.subr.bf16.mxu1 %v6193_v5 }
 0x386   : > { %4068 = vmatpush3.bf16.msk.msra.mxu1 %vm5465_vm9, %v6127_v56 }
 0x387   : > { %4069 = vmatprep.subr.bf16.mxu1 %v6193_v5 }
 0x38a   : > { %4071 = vmatpush3.bf16.msk.msra.mxu1 %vm5519_vm10, %v6127_v56 }
 0x38b   : > { %4072 = vmatprep.subr.bf16.mxu1 %v6193_v5 }
 0x38e   : > { %4074 = vmatpush3.bf16.msk.msra.mxu1 %vm5557_vm8, %v6127_v56 }
 0x38f   : > { %4075 = vmatprep.subr.bf16.mxu1 %v6193_v5 }
 0x392   : > { %4077 = vmatpush3.bf16.msk.msra.mxu1 %vm5594_vm11, %v6127_v56 }
 0x393   : > { %4078 = vmatprep.subr.bf16.mxu1 %v6193_v5 }
 0x395   : > { %3700 = vmatmul.mubr.f32.vlgmr.msra.gmra.mrb[0].mxu1 %v6200_v47 }
 0x396   : > { %4080 = vmatpush3.bf16.msra.mxu1 %v5580_v8  ;;  %3702 = vmatprep.mubr.msk.f32.mxu1 %vm6195_vm4, %v6147_v50  ;;  %v6204_v8 = vld [vmem:[#allocation27_spill] sm:$0xff] }
 0x397   : > { %4081 = vmatprep.subr.bf16.mxu1 %v6193_v5  ;;  %v2410_v21 = vrot.slane %v6204_v8, 6 }
 0x399   : > { %3703 = vmatmul.mubr.f32.gmra.mrb[2].mxu1 %v6201_v48 }
 0x39a   : > { %4083 = vmatpush3.bf16.msra.mxu1 %v5582_v40  ;;  %3705 = vmatprep.mubr.msk.f32.mxu1 %vm6195_vm4, %v6147_v50 }
 0x39b   : > { %4084 = vmatprep.subr.bf16.mxu1 %v6193_v5 }
 0x39d   : > { %3706 = vmatmul.mubr.f32.gmra.mrb[4].mxu1 %v6202_v34 }
 0x39e   : > { %4086 = vmatpush3.bf16.msra.mxu1 %v5584_v4  ;;  %3740 = vmatprep.mubr.msk.f32.mxu1 %vm6195_vm4, %v6147_v50 }
 0x39f   : > { %4087 = vmatprep.subr.bf16.mxu1 %v6193_v5 }
 0x3a2   : > { %4089 = vmatpush3.bf16.msra.mxu1 %v5586_v54  ;;  %v6205_v54 = vld [vmem:[#allocation23_spill] sm:$0xff] }
 0x3a3   : > { %4090 = vmatprep.subr.bf16.mxu1 %v6193_v5 }
 0x3a6   : > { %4092 = vmatpush3.bf16.msra.mxu1 %v5598_v22 }
 0x3a7   : > { %4093 = vmatprep.subr.bf16.mxu1 %v6193_v5 }
 0x3aa   : > { %4095 = vmatpush3.bf16.msra.mxu1 %v5600_v30 }
 0x3ab   : > { %4096 = vmatprep.subr.bf16.mxu1 %v6193_v5 }
 0x3ae   : > { %4098 = vmatpush3.bf16.msra.mxu1 %v5606_v13 }
 0x3af   : > { %4099 = vmatprep.subr.bf16.mxu1 %v6193_v5 }
 0x3b2   : > { %4101 = vmatpush3.bf16.msra.mxu1 %v5612_v9  ;;  %v6203_v9 = vld [vmem:[#allocation25_spill] sm:$0xff] }
 0x3b3   : > { %4102 = vmatprep.subr.bf16.mxu1 %v6193_v5  ;;  %v2402_v4 = vrot.slane %v6203_v9, 7 }
 0x3b5   : > { %3741 = vmatmul.mubr.f32.vlgmr.msra.gmra.mrb[0].mxu1 %v5315_v20 }
 0x3b6   : > { %4104 = vmatpush3.bf16.msk.msra.mxu1 %vm5317_vm2, %v6127_v56  ;;  %3743 = vmatprep.mubr.msk.f32.mxu1 %vm6195_vm4, %v6147_v50 }
 0x3b7   : > { %4105 = vmatprep.subr.bf16.mxu1 %v6193_v5 }
 0x3b9   : > { %3744 = vmatmul.mubr.f32.gmra.mrb[2].mxu1 %v5335_v3 }
 0x3ba   : > { %4107 = vmatpush3.bf16.msk.msra.mxu1 %vm5343_vm7, %v6127_v56  ;;  %3746 = vmatprep.mubr.msk.f32.mxu1 %vm6195_vm4, %v6147_v50 }
 0x3bb   : > { %4108 = vmatprep.subr.bf16.mxu1 %v6193_v5 }
 0x3bd   : > { %3747 = vmatmul.mubr.f32.gmra.mrb[4].mxu1 %v5364_v35 }
 0x3be   : > { %4110 = vmatpush3.bf16.msk.msra.mxu1 %vm5376_vm5, %v6127_v56  ;;  %3781 = vmatprep.mubr.msk.f32.mxu1 %vm6195_vm4, %v6147_v50 }
 0x3bf   : > { %4111 = vmatprep.subr.bf16.mxu1 %v6193_v5 }
 0x3c2   : > { %4113 = vmatpush3.bf16.msk.msra.mxu1 %vm5417_vm12, %v6127_v56 }
 0x3c3   : > { %4114 = vmatprep.subr.bf16.mxu1 %v6193_v5 }
 0x3c6   : > { %4116 = vmatpush3.bf16.msk.msra.mxu1 %vm5465_vm9, %v6127_v56 }
 0x3c7   : > { %4117 = vmatprep.subr.bf16.mxu1 %v6193_v5 }
 0x3ca   : > { %4119 = vmatpush3.bf16.msk.msra.mxu1 %vm5519_vm10, %v6127_v56 }
 0x3cb   : > { %4120 = vmatprep.subr.bf16.mxu1 %v6193_v5 }
 0x3ce   : > { %4122 = vmatpush3.bf16.msk.msra.mxu1 %vm5557_vm8, %v6127_v56 }
 0x3cf   : > { %4123 = vmatprep.subr.bf16.mxu1 %v6193_v5 }
 0x3d2   : > { %4125 = vmatpush3.bf16.msk.msra.mxu1 %vm5594_vm11, %v6127_v56 }
 0x3d5   : > { %3782 = vmatmul.mubr.f32.vlgmr.msra.gmra.mrb[0].mxu1 %v5315_v20 }
 0x3d6   : > { %3784 = vmatprep.mubr.msk.f32.mxu1 %vm6195_vm4, %v6147_v50 }
 0x3d9   : > { %3785 = vmatmul.mubr.f32.gmra.mrb[2].mxu1 %v5335_v3 }
 0x3da   : > { %3787 = vmatprep.mubr.msk.f32.mxu1 %vm6195_vm4, %v6147_v50 }
 0x3dd   : > { %3788 = vmatmul.mubr.f32.gmra.mrb[4].mxu1 %v5364_v35 }
 0x4a8   : > { %v2384_v12 = vpop.f32.mrb[0].mxu1 }
 0x4a9   : > { %v2404_v1 = vmul.f32 %v2402_v4, %v2384_v12  ;;  %v2412_v57 = vmul.f32 %v2410_v21, %v2384_v12  ;;  %v3783_v56 = vpop.f32.mrb[1].mxu1  ;;  %v2400_v20 = vmul.f32 %v2384_v12, %v6205_v54 }
 0x4ab   : > { %v2406_v29 = vrot.slane %v2404_v1, 1  ;;  %v2414_v3 = vrot.slane %v2412_v57, 2 }
 0x4ac   : > { %v5807_v15 = vpop.f32.mrb[2].mxu1 }
 0x4ad   : > { %v2408_v0 = vadd.f32 %v2406_v29, %v2400_v20  ;;  %v3786_v6 = vpop.f32.mrb[3].mxu1 }
 0x4af   : > { %v2416_v31 = vadd.f32 %v2414_v3, %v2408_v0 }
 0x4b0   : > { %v5809_v43 = vpop.f32.mrb[4].mxu1 }
 0x4b1   : > { %v2417_v35 = vmul.f32 %v2416_v31, %v2384_v12  ;;  %v2420_v14 = vrot.slane %v2416_v31, 7  ;;  %v2427_v58 = vrot.slane %v2416_v31, 6  ;;  %v3789_v46 = vpop.f32.mrb[5].mxu1  ;;  %v2810_v53 = vrot.slane %v2416_v31, 4 }
 0x4b2   : > { %v2830_v28 = vrot.slane %v2416_v31, 3  ;;  %v2850_v13 = vrot.slane %v2416_v31, 2 }
 0x4b3   : > { %v5812_v24 = vsub.f32 %v6206_v37, %v2417_v35  ;;  %v2422_v40 = vmul.f32 %v2420_v14, %v2384_v12  ;;  %v2429_v62 = vmul.f32 %v2427_v58, %v2384_v12  ;;  %v5815_v22 = vmul.f32 %v2810_v53, %v5807_v15 }
 0x4b4   : > { %v5818_v30 = vmul.f32 %v2830_v28, %v5807_v15  ;;  %v5837_v39 = vmul.f32 %v2850_v13, %v5807_v15 }
 0x4b5   : > { %v2424_v5 = vrot.slane %v2422_v40, 1  ;;  %v2431_v42 = vrot.slane %v2429_v62, 2  ;;  %v2476_v27 = vrot.slane %v5812_v24, 2  ;;  %v2513_v33 = vrot.slane %v5812_v24, 7 }
 0x4b6   : > { %v2435_v61 = vrot.slane %v5812_v24, 5 }
 0x4b7   : > { %v5824_v44 = vsub.f32 %v6207_v60, %v2424_v5  ;;  %v5827_v16 = vsub.f32 %v6208_v36, %v2431_v42  ;;  %v5829_v51 = vsub.f32 %v2384_v12, %v2476_v27  ;;  %v5832_v11 = vsub.f32 %v5807_v15, %v2513_v33 }
 0x4b8   : > { %v5834_v38 = vsub.f32 %v2384_v12, %v2435_v61 }
 0x4b9   : > { %v2479_v32 = vrot.slane %v5824_v44, 1  ;;  %v5842_v49 = vsub.f32 %v5807_v15, %v5827_v16  ;;  %v2516_v2 = vrot.slane %v5824_v44, 6  ;;  %v2519_v10 = vrot.slane %v5827_v16, 5 }
 0x4ba   : > { %v2439_v26 = vrot.slane %v5824_v44, 4  ;;  %v2443_v63 = vrot.slane %v5827_v16, 3  ;;  %v2483_v47 = vmul.f32 %v5829_v51, %v5829_v51  ;;  %v2522_v34 = vmul.f32 %v5832_v11, %v5832_v11 }
 0x4bb   : > { %v5848_v19 = vsub.f32 %v2384_v12, %v2479_v32  ;;  %v5851_v59 = vsub.f32 %v5807_v15, %v2516_v2  ;;  %v5856_v23 = vsub.f32 %v5807_v15, %v2519_v10  ;;  %v2489_v41 = vmul.f32 %v5842_v49, %v5842_v49 }
 0x4bc   : > { %v5858_v55 = vsub.f32 %v2384_v12, %v2439_v26  ;;  %v5860_v7 = vsub.f32 %v2384_v12, %v2443_v63  ;;  %v2446_v4 = vmul.f32 %v5834_v38, %v5834_v38 }
 0x4bd   : > { %v2484_v17 = vmul.f32 %v5848_v19, %v5848_v19  ;;  %v2523_v18 = vmul.f32 %v5851_v59, %v5851_v59  ;;  %v2528_v52 = vmul.f32 %v5856_v23, %v5856_v23  ;;  %v2491_v12 = vrot.slane %v2489_v41, 2 }
 0x4be   : > { %v2447_v25 = vmul.f32 %v5858_v55, %v5858_v55  ;;  %v2452_v45 = vmul.f32 %v5860_v7, %v5860_v7 }
 0x4bf   : > { %v2486_v48 = vrot.slane %v2484_v17, 1  ;;  %v2525_v9 = vrot.slane %v2523_v18, 1  ;;  %v2530_v57 = vrot.slane %v2528_v52, 2 }
 0x4c0   : > { %v2449_v8 = vrot.slane %v2447_v25, 1  ;;  %v2454_v54 = vrot.slane %v2452_v45, 2  ;;  %v2585_v45 = vrot.slane %v5812_v24, 1 }
 0x4c1   : > { %v2488_v21 = vadd.f32 %v2486_v48, %v2483_v47  ;;  %v2527_v1 = vadd.f32 %v2525_v9, %v2522_v34  ;;  %v2658_v47 = vrot.slane %v5812_v24, 6  ;;  %v2593_v9 = vrot.slane %v5827_v16, 2 }
 0x4c2   : > { %v2451_v56 = vadd.f32 %v2449_v8, %v2446_v4  ;;  %v2661_v4 = vrot.slane %v5824_v44, 5  ;;  %v2668_v8 = vrot.slane %v5827_v16, 7 }
 0x4c3   : > { %v2493_v20 = vadd.f32 %v2491_v12, %v2488_v21  ;;  %v2532_v29 = vadd.f32 %v2530_v57, %v2527_v1 }
 0x4c4   : > { %v2456_v0 = vadd.f32 %v2454_v54, %v2451_v56 }
 0x4c5   : > { %4237 = vrsqrt.f32 %v2493_v20  ;;  %vm2496_vm2 = vcmp.eq.f32.partialorder %v2493_v20, inf  ;;  %vm2498_vm7 = vcmp.eq.f32.partialorder %v2493_v20, 0.0  ;;  %v2499_v14 = vand.u32 2147483648, %v2493_v20 }
 0x4c6   : > { %4239 = vrsqrt.f32 %v2532_v29  ;;  %vm2535_vm5 = vcmp.eq.f32.partialorder %v2532_v29, inf  ;;  %vm2537_vm12 = vcmp.eq.f32.partialorder %v2532_v29, 0.0  ;;  %v2538_v53 = vand.u32 2147483648, %v2532_v29 }
 0x4c7   : > { %4241 = vrsqrt.f32 %v2456_v0  ;;  %vm2459_vm13 = vcmp.eq.f32.partialorder %v2456_v0, inf  ;;  %v2462_v62 = vand.u32 2147483648, %v2456_v0  ;;  %vm2461_vm14 = vcmp.eq.f32.partialorder %v2456_v0, 0.0 }
 0x4cf   : > { %v4238_v3 = vpop.eup %4237 }
 0x4d0   : > { %v4240_v6 = vpop.eup %4239  ;;  %v2495_v31 = vmul.f32 %v4238_v3, %v2493_v20 }
 0x4d1   : > { %v4242_v35 = vpop.eup %4241  ;;  %v2534_v58 = vmul.f32 %v4240_v6, %v2532_v29 }
 0x4d2   : > { %v2497_v46 = vsel %vm2496_vm2, %v2493_v20, %v2495_v31  ;;  %v2458_v28 = vmul.f32 %v4242_v35, %v2456_v0 }
 0x4d3   : > { %v2500_v37 = vsel %vm2498_vm7, %v2499_v14, %v2497_v46  ;;  %v2536_v40 = vsel %vm2535_vm5, %v2532_v29, %v2534_v58  ;;  %vm2866_vm5 = vcmask 1040384  }
 0x4d4   : > { %v5880_v13 = vmax.f32 %v2500_v37, 1e-08  ;;  %v2539_v5 = vsel %vm2537_vm12, %v2538_v53, %v2536_v40  ;;  %v2460_v42 = vsel %vm2459_vm13, %v2456_v0, %v2458_v28  ;;  %vm2868_vm12 = vcmask 1041408  }
 0x4d5   : > { %v5882_v27 = vmax.f32 %v2539_v5, 1e-08  ;;  %v2463_v33 = vsel %vm2461_vm14, %v2462_v62, %v2460_v42 }
 0x4d6   : > { %4243 = vrcp.f32 %v5880_v13  ;;  %v2509_v61 = vrot.slane %v5880_v13, 6  ;;  %v5886_v60 = vmax.f32 %v2463_v33, 1e-08  ;;  %v2505_v26 = vrot.slane %v5880_v13, 7 }
 0x4d7   : > { %4245 = vrcp.f32 %v5882_v27  ;;  %v2548_v36 = vrot.slane %v5882_v27, 6  ;;  %v2544_v63 = vrot.slane %v5882_v27, 7 }
 0x4d8   : > { %4247 = vrcp.f32 %v2509_v61  ;;  %v2468_v32 = vrot.slane %v5886_v60, 7  ;;  %v2472_v2 = vrot.slane %v5886_v60, 6 }
 0x4d9   : > { %4249 = vrcp.f32 %v2548_v36 }
 0x4da   : > { %4251 = vrcp.f32 %v5886_v60 }
 0x4db   : > { %4253 = vrcp.f32 %v2468_v32 }
 0x4dc   : > { %4255 = vrcp.f32 %v2472_v2 }
 0x4dd   : > { %4257 = vrcp.f32 %v2505_v26 }
 0x4de   : > { %4259 = vrcp.f32 %v2544_v63 }
 0x4e0   : > { %v4244_v17 = vpop.eup %4243 }
 0x4e1   : > { %v4246_v41 = vpop.eup %4245  ;;  %v5902_v18 = vmul.f32 %v4244_v17, %v5829_v51 }
 0x4e2   : > { %v4248_v52 = vpop.eup %4247  ;;  %v2542_v25 = vmul.f32 %v4246_v41, %v5832_v11 }
 0x4e3   : > { %v4250_v48 = vpop.eup %4249  ;;  %v2512_v34 = vmul.f32 %v4248_v52, %v5842_v49  ;;  %v2715_v1 = vrot.slane %v5902_v18, 1  ;;  %v2728_v11 = vrot.slane %v5902_v18, 2 }
 0x4e4   : > { %v4252_v21 = vpop.eup %4251  ;;  %v2551_v51 = vmul.f32 %v4250_v48, %v5856_v23  ;;  %v2565_v12 = vrot.slane %v2542_v25, 1  ;;  %v2578_v54 = vrot.slane %v2542_v25, 2 }
 0x4e5   : > { %v4254_v57 = vpop.eup %4253  ;;  %v5915_v56 = vmul.f32 %v4252_v21, %v5834_v38  ;;  %v2703_v49 = vrot.slane %v2512_v34, 4  ;;  %v2718_v20 = vrot.slane %v2512_v34, 5 }
 0x4e6   : > { %v4256_v29 = vpop.eup %4255  ;;  %v2553_v0 = vrot.slane %v2551_v51, 4  ;;  %v2568_v3 = vrot.slane %v2551_v51, 5  ;;  %v5918_v6 = vmul.f32 %v4254_v57, %v5858_v55  ;;  %v2567_v31 = vmul.f32 %v2565_v12, %v2512_v34 }
 0x4e7   : > { %v4258_v23 = vpop.eup %4257  ;;  %v2475_v35 = vmul.f32 %v4256_v29, %v5860_v7  ;;  %v2639_v14 = vmul.f32 %v2551_v51, %v5915_v56  ;;  %v2651_v58 = vrot.slane %v5915_v56, 1  ;;  %v5924_v38 = vmul.f32 %v2718_v20, %v5915_v56 }
 0x4e8   : > { %v4260_v46 = vpop.eup %4259  ;;  %v5927_v53 = vmul.f32 %v4258_v23, %v5848_v19  ;;  %v2570_v28 = vmul.f32 %v2568_v3, %v5902_v18  ;;  %v2632_v55 = vrot.slane %v5918_v6, 1  ;;  %v2647_v37 = vrot.slane %v5918_v6, 3 }
 0x4e9   : > { %v2547_v40 = vmul.f32 %v4260_v46, %v5851_v59  ;;  %v2628_v7 = vrot.slane %v2475_v35, 3  ;;  %v2640_v62 = vrot.slane %v2475_v35, 4  ;;  %v2705_v5 = vmul.f32 %v2703_v49, %v5918_v6 }
 0x4ea   : > { %v2555_v42 = vmul.f32 %v2553_v0, %v5927_v53  ;;  %v2572_v33 = vrot.slane %v2570_v28, 6  ;;  %v2580_v61 = vmul.f32 %v2578_v54, %v5927_v53  ;;  %v2634_v36 = vmul.f32 %v2632_v55, %v2551_v51 }
 0x4eb   : > { %v2557_v19 = vrot.slane %v2547_v40, 2  ;;  %v2575_v2 = vrot.slane %v2547_v40, 4  ;;  %v2630_v17 = vmul.f32 %v2628_v7, %v2547_v40  ;;  %v2642_v41 = vmul.f32 %v2640_v62, %v2542_v25 }
 0x4ec   : > { %v2574_v52 = vsub.f32 %v2567_v31, %v2572_v33  ;;  %v2582_v48 = vrot.slane %v2580_v61, 1  ;;  %v2636_v21 = vrot.slane %v2634_v36, 1  ;;  %v2649_v12 = vmul.f32 %v2647_v37, %v2542_v25 }
 0x4ed   : > { %v2559_v57 = vmul.f32 %v2557_v19, %v2512_v34  ;;  %v2577_v59 = vmul.f32 %v2575_v2, %v5902_v18  ;;  %v2644_v20 = vrot.slane %v2642_v41, 6  ;;  %v2653_v29 = vmul.f32 %v2651_v58, %v2547_v40 }
 0x4ee   : > { %v2588_v49 = vmul.f32 %v2574_v52, %v5824_v44  ;;  %v2605_v0 = vmul.f32 %v2574_v52, %v2574_v52  ;;  %v2638_v3 = vsub.f32 %v2630_v17, %v2636_v21  ;;  %v2707_v54 = vrot.slane %v5927_v53, 2 }
 0x4ef   : > { %v2561_v51 = vrot.slane %v2559_v57, 1  ;;  %v2584_v23 = vsub.f32 %v2577_v59, %v2582_v48  ;;  %v2646_v46 = vsub.f32 %v2639_v14, %v2644_v20  ;;  %v2655_v28 = vrot.slane %v2653_v29, 1 }
 0x4f0   : > { %v2590_v55 = vrot.slane %v2588_v49, 1  ;;  %v2607_v31 = vrot.slane %v2605_v0, 1  ;;  %v2660_v7 = vmul.f32 %v2658_v47, %v2638_v3  ;;  %v2679_v62 = vmul.f32 %v2638_v3, %v2638_v3 }
 0x4f1   : > { %v2563_v25 = vsub.f32 %v2555_v42, %v2561_v51  ;;  %v2595_v34 = vmul.f32 %v2593_v9, %v2584_v23  ;;  %v2610_v37 = vmul.f32 %v2584_v23, %v2584_v23  ;;  %v2657_v33 = vsub.f32 %v2649_v12, %v2655_v28 }
 0x4f2   : > { %v2663_v58 = vmul.f32 %v2661_v4, %v2646_v46  ;;  %v2680_v40 = vmul.f32 %v2646_v46, %v2646_v46  ;;  %v2709_v61 = vmul.f32 %v2707_v54, %v2475_v35  ;;  %v2717_v36 = vmul.f32 %v2715_v1, %v2475_v35 }
 0x4f3   : > { %v2587_v19 = vmul.f32 %v2585_v45, %v2563_v25  ;;  %v2597_v2 = vrot.slane %v2595_v34, 7  ;;  %v2604_v14 = vmul.f32 %v2563_v25, %v2563_v25  ;;  %v2612_v17 = vrot.slane %v2610_v37, 7 }
 0x4f4   : > { %v2665_v41 = vrot.slane %v2663_v58, 1  ;;  %v2670_v47 = vmul.f32 %v2668_v8, %v2657_v33  ;;  %v2682_v42 = vrot.slane %v2680_v40, 1  ;;  %v2685_v9 = vmul.f32 %v2657_v33, %v2657_v33 }
 0x4f5   : > { %v2592_v52 = vadd.f32 %v2590_v55, %v2587_v19  ;;  %v2609_v48 = vadd.f32 %v2607_v31, %v2604_v14  ;;  %v2711_v21 = vrot.slane %v2709_v61, 1  ;;  %v2722_v4 = vrot.slane %v5924_v38, 6 }
 0x4f6   : > { %v2667_v12 = vadd.f32 %v2665_v41, %v2660_v7  ;;  %v2672_v57 = vrot.slane %v2670_v47, 7  ;;  %v2684_v1 = vadd.f32 %v2682_v42, %v2679_v62  ;;  %v2687_v35 = vrot.slane %v2685_v9, 7 }
 0x4f7   : > { %v2599_v59 = vadd.f32 %v2597_v2, %v2592_v52  ;;  %v2614_v45 = vadd.f32 %v2612_v17, %v2609_v48  ;;  %v2713_v20 = vsub.f32 %v2705_v5, %v2711_v21  ;;  %v2724_v29 = vsub.f32 %v2717_v36, %v2722_v4 }
 0x4f8   : > { %v2674_v49 = vadd.f32 %v2672_v57, %v2667_v12  ;;  %v2689_v0 = vadd.f32 %v2687_v35, %v2684_v1  ;;  %v2725_v3 = vrot.slane %v5927_v53, 4  ;;  %v2730_v8 = vmul.f32 %v2728_v11, %v5918_v6 }
 0x4f9   : > { %4261 = vrsqrt.f32 %v2614_v45  ;;  %v2735_v38 = vrot.slane %v5812_v24, 4  ;;  %v2738_v54 = vrot.slane %v5824_v44, 3  ;;  %v2755_v28 = vmul.f32 %v2724_v29, %v2724_v29 }
 0x4fa   : > { %4263 = vrsqrt.f32 %v2689_v0  ;;  %v2727_v51 = vmul.f32 %v2725_v3, %v5915_v56  ;;  %v2732_v23 = vrot.slane %v2730_v8, 1  ;;  %v2754_v7 = vmul.f32 %v2713_v20, %v2713_v20 }
 0x4fb   : > { %v2737_v46 = vmul.f32 %v2735_v38, %v2713_v20  ;;  %v2740_v5 = vmul.f32 %v2738_v54, %v2724_v29  ;;  %v2757_v53 = vrot.slane %v2755_v28, 1  ;;  %v2622_v24 = vrot.slane %v5882_v27, 2 }
 0x4fc   : > { %v2734_v55 = vsub.f32 %v2727_v51, %v2732_v23  ;;  %vm2600_vm15 = vcmp.gt.f32.partialorder %v2599_v59, 0.0  ;;  %vm2601_vm0 = vcmp.lt.f32.partialorder %v2599_v59, 0.0  ;;  %v2697_v37 = vrot.slane %v5886_v60, 1 }
 0x4fd   : > { %v2742_v31 = vrot.slane %v2740_v5, 1  ;;  %v2759_v6 = vadd.f32 %v2757_v53, %v2754_v7  ;;  %vm2617_vm1 = vcmp.eq.f32.partialorder %v2614_v45, inf  ;;  %v2620_v58 = vand.u32 2147483648, %v2614_v45 }
 0x4fe   : > { %v2745_v18 = vmul.f32 %v2734_v55, %v2519_v10  ;;  %v2760_v11 = vmul.f32 %v2734_v55, %v2734_v55  ;;  %vm2619_vm3 = vcmp.eq.f32.partialorder %v2614_v45, 0.0  ;;  %vm2676_vm6 = vcmp.lt.f32.partialorder %v2674_v49, 0.0 }
 0x4ff   : > { %v2744_v62 = vadd.f32 %v2742_v31, %v2737_v46  ;;  %vm2692_vm9 = vcmp.eq.f32.partialorder %v2689_v0, inf  ;;  %v2695_v19 = vand.u32 2147483648, %v2689_v0  ;;  %v2602_v2 = vsel %vm2601_vm0, -1.0, %v6147_v50 }
 0x500   : > { %v2747_v44 = vrot.slane %v2745_v18, 7  ;;  %v2762_v34 = vrot.slane %v2760_v11, 7  ;;  %vm2694_vm10 = vcmp.eq.f32.partialorder %v2689_v0, 0.0  ;;  %vm2675_vm8 = vcmp.gt.f32.partialorder %v2674_v49, 0.0 }
 0x501   : > { %v2677_v42 = vsel %vm2676_vm6, -1.0, %v6147_v50  ;;  %v2603_v52 = vsel %vm2600_vm15, 1.0, %v2602_v2  ;;  %v2772_v29 = vrot.slane %v5880_v13, 2  ;;  %v2803_v46 = vrot.slane %v5809_v43, 1 }
 0x502   : > { %v2749_v40 = vadd.f32 %v2747_v44, %v2744_v62  ;;  %v2764_v61 = vadd.f32 %v2762_v34, %v2759_v6  ;;  %v2678_v4 = vsel %vm2675_vm8, 1.0, %v2677_v42  ;;  %v2843_v53 = vrot.slane %v5809_v43, 3 }
 0x503   : > { %v4262_v25 = vpop.eup %4261  ;;  %v2854_v2 = vrot.slane %v5837_v39, 7 }
 0x504   : > { %v2616_v56 = vmul.f32 %v4262_v25, %v2614_v45  ;;  %v4264_v33 = vpop.eup %4263  ;;  %4265 = vrsqrt.f32 %v2764_v61  ;;  %vm2751_vm11 = vcmp.lt.f32.partialorder %v2749_v40, 0.0  ;;  %vm2767_vm4 = vcmp.eq.f32.partialorder %v2764_v61, inf }
 0x505   : > { %v2691_v16 = vmul.f32 %v4264_v33, %v2689_v0  ;;  %v2770_v20 = vand.u32 2147483648, %v2764_v61  ;;  %vm2769_vm2 = vcmp.eq.f32.partialorder %v2764_v61, 0.0  ;;  %vm2750_vm7 = vcmp.gt.f32.partialorder %v2749_v40, 0.0 }
 0x506   : > { %v2618_v36 = vsel %vm2617_vm1, %v2614_v45, %v2616_v56  ;;  %v2752_v59 = vsel %vm2751_vm11, -1.0, %v6147_v50  ;;  %v2823_v50 = vrot.slane %v5809_v43, 2 }
 0x507   : > { %v2621_v10 = vsel %vm2619_vm3, %v2620_v58, %v2618_v36  ;;  %v2693_v17 = vsel %vm2692_vm9, %v2689_v0, %v2691_v16  ;;  %v2834_v36 = vrot.slane %v5818_v30, 6 }
 0x508   : > { %v2624_v14 = vmul.f32 %v2622_v24, %v2621_v10  ;;  %v2696_v41 = vsel %vm2694_vm10, %v2695_v19, %v2693_v17 }
 0x509   : > { %v2699_v9 = vmul.f32 %v2697_v37, %v2696_v41 }
 0x50a   : > { %v2625_v47 = vmul.f32 %v2624_v14, %v2505_v26 }
 0x50b   : > { %v2700_v21 = vmul.f32 %v2699_v9, %v2544_v63  ;;  %v2753_v63 = vsel %vm2750_vm7, 1.0, %v2752_v59 }
 0x50c   : > { %v2626_v48 = vmul.f32 %v2625_v47, %v2603_v52 }
 0x50d   : > { %v2701_v12 = vmul.f32 %v2700_v21, %v2678_v4 }
 0x50e   : > { %v4266_v1 = vpop.eup %4265 }
 0x50f   : > { %v2778_v57 = vrot.slane %v2701_v12, 3  ;;  %v2766_v35 = vmul.f32 %v4266_v1, %v2764_v61 }
 0x511   : > { %v2780_v45 = vadd.f32 %v2778_v57, %v2626_v48  ;;  %v2768_v26 = vsel %vm2767_vm4, %v2764_v61, %v2766_v35 }
 0x512   : > { %v2771_v49 = vsel %vm2769_vm2, %v2770_v20, %v2768_v26 }
 0x513   : > { %v2774_v0 = vmul.f32 %v2772_v29, %v2771_v49 }
 0x515   : > { %v2775_v27 = vmul.f32 %v2774_v0, %v2468_v32 }
 0x517   : > { %v2776_v3 = vmul.f32 %v2775_v27, %v2753_v63 }
 0x519   : > { %v2782_v8 = vrot.slane %v2776_v3, 5 }
 0x51b   : > { %v2784_v38 = vadd.f32 %v2782_v8, %v2780_v45 }
 0x51d   : > { %4267 = vrcp.f32 %v2784_v38  ;;  %v2788_v54 = vrot.slane %v2784_v38, 5  ;;  %v2792_v51 = vrot.slane %v2784_v38, 3 }
 0x51f   : > { %4269 = vrcp.f32 %v2788_v54 }
 0x520   : > { %4271 = vrcp.f32 %v2792_v51 }
 0x527   : > { %v4268_v23 = vpop.eup %4267 }
 0x528   : > { %v2786_v13 = vmul.f32 %v4268_v23, %v2626_v48 }
 0x529   : > { %v4270_v5 = vpop.eup %4269 }
 0x52a   : > { %v4272_v28 = vpop.eup %4271  ;;  %v2791_v60 = vmul.f32 %v4270_v5, %v2701_v12  ;;  %v2796_v32 = vmul.f32 %v2786_v13, %v5807_v15  ;;  %v2817_v55 = vmul.f32 %v2803_v46, %v2786_v13  ;;  %v2837_v31 = vmul.f32 %v2823_v50, %v2786_v13 }
 0x52b   : > { %v2795_v7 = vmul.f32 %v4272_v28, %v2776_v3 }
 0x52c   : > { %v2797_v62 = vmul.f32 %v2791_v60, %v5809_v43  ;;  %v2818_v18 = vmul.f32 %v2803_v46, %v2791_v60  ;;  %v2838_v11 = vmul.f32 %v2823_v50, %v2791_v60  ;;  %v2814_v43 = vrot.slane %v5815_v22, 5 }
 0x52d   : > { %v2805_v6 = vmul.f32 %v2803_v46, %v2795_v7  ;;  %v2825_v25 = vmul.f32 %v2823_v50, %v2795_v7  ;;  %v2845_v24 = vmul.f32 %v2843_v53, %v2795_v7 }
 0x52e   : > { %v2799_v44 = vrot.slane %v2797_v62, 3  ;;  %v2820_v34 = vrot.slane %v2818_v18, 3  ;;  %v2840_v56 = vrot.slane %v2838_v11, 3 }
 0x52f   : > { %v2807_v37 = vrot.slane %v2805_v6, 5  ;;  %v2827_v33 = vrot.slane %v2825_v25, 5  ;;  %v2847_v61 = vrot.slane %v2845_v24, 5 }
 0x530   : > { %v2801_v15 = vadd.f32 %v2799_v44, %v2796_v32  ;;  %v2822_v58 = vadd.f32 %v2820_v34, %v2817_v55  ;;  %v2842_v40 = vadd.f32 %v2840_v56, %v2837_v31 }
 0x532   : > { %v2809_v16 = vadd.f32 %v2807_v37, %v2801_v15  ;;  %v2829_v10 = vadd.f32 %v2827_v33, %v2822_v58  ;;  %v2849_v19 = vadd.f32 %v2847_v61, %v2842_v40 }
 0x534   : > { %v2816_v14 = vadd.f32 %v2814_v43, %v2809_v16  ;;  %v2836_v17 = vadd.f32 %v2834_v36, %v2829_v10  ;;  %v2856_v41 = vadd.f32 %v2854_v2, %v2849_v19 }
 0x536   : > { %v2858_v47 = vrot.slane %v2816_v14, 7  ;;  %v2861_v42 = vrot.slane %v2836_v17, 6  ;;  %v2864_v9 = vrot.slane %v2856_v41, 5 }
 0x538   : > { %v2867_v22 = vsel %vm2866_vm5, %v2858_v47, %v2861_v42 }
 0x539   : > { %v2869_v30 = vsel %vm2868_vm12, %v2867_v22, %v2864_v9 }
 0x53a   : > { %2870 = vst [vmem:[%s188_s30] sm:$0x7] %v2869_v30 }
 0x53b   : > { %4292 = shalt.err (!%p4289_p3)
}
 0x53c   : > { %s4293_s13 = scalar_lea.hbm %s5984_s8, 64  ;;  %s4297_s22 = scalar_lea.hbm %s6032_s4, 128 }
 0x53d   : > { %p4294_p4 = scmp.ne.s32.totalorder %s5984_s8, %s4293_s13  ;;  %p4298_p9 = scmp.lt.u32.totalorder %s5984_s8, %s6032_s4 }
 0x53e   : > { %p4299_p10 = scmp.lt.u32.totalorder %s4297_s22, %s4293_s13  ;;  %p4301_p12 = scmp.lt.u32.totalorder %s4293_s13, %s5984_s8 }
 0x53f   : > { %p4295_p7 = pnand %p4294_p4, %p4414_p5 }
 0x540   : > { %p4300_p11 = por %p4299_p10, %p4298_p9 }
 0x541   : > { %p4296_p8 = pneg %p4295_p7 }
 0x542   : > { %p4302_p13 = por %p4301_p12, %p4300_p11 }
 0x544   : > { %p4303_p0 = pnand %p4302_p13, %p4296_p8 }
 0x546   : > { %4306 = shalt.err (!%p4303_p0)
}
 0x547   : > { %4176 = dma.vmem_to_hbm [thread:$0]  (%p4414_p5), %s5986_s5, 64, %s5984_s8, %s2872_s19  }
 0x548 PF: > { %p4182_p1 = scmp.ge.s32.totalorder %s4341_s18, 2  ;;  %s2897_s28 = sand.u32 1, %s4329_s15  }
 0x549   : > { %s2898_s29 = scalar_lea.sflag [#allocation3], %s2897_s28 }
 0x54a   : > { %p4179_p2 = pnand %p4182_p1, %p4418_p6 }
 0x54c   : > { %4324 = dma.done.wait (!%p4179_p2), %s2898_s29, 64  }
 0x54d   : > { %4326 = vsyncadd (!%p4179_p2), %s2898_s29, 4294967232  ;;  %p14_p3 = scmp.ge.s32.totalorder %s4401_s21, 4   ;;  %s6209_s15 = smov %s4333_s16 }
 0x54e   : > { %s6210_s16 = smov %s4337_s17  ;;  %s6211_s17 = smov %s4412_s24 }
 0x54f   : > { %s6212_s18 = smov %s4401_s21  ;;  %16 = sbr.rel (!%p14_p3) target bundleno = 3 (0x3), region = 71 }
 0x556   :  { %2903 = vsyncpa [#allocation3], 1 }
 0x557   :  { %2905 = vsyncpa [#allocation3 + $0x1], 1 }

</bundles_post_ra>
